<compile_context>
chip_gen: v6e
topology: v6e:2x2x1
jax: 0.10.0
libtpu: 0.0.40
codegen_flags: <defaults>
</compile_context>

<pallas_src>
import functools
import math

import jax
import jax.numpy as jnp
from jax import lax
from jax.experimental import pallas as pl
from jax.experimental.pallas import tpu as pltpu


# ----------------------------------------------------------------------------
# Fused kernel: grid=(3,) over LSTM layers (time recurrence in-kernel),
# FC head executed on the last layer's grid step.
# Gate column order (after param-prep repack): (i, f, o | g).
# ----------------------------------------------------------------------------
def _fused_lstm_mlp_kernel(T, Bp,
                           x_ref, wih_ref, whh_ref, b_ref,
                           fw1_ref, fb1_ref, fw2_ref, fb2_ref,
                           out_ref,
                           gx_scr, act_scr):
    layer = pl.program_id(0)
    last_layer = pl.num_programs(0) - 1
    H = whh_ref.shape[0]

    wih = wih_ref[...]       # (H, 4H) bf16
    bias = b_ref[...]        # (1, 4H) f32

    # Hoisted input projection + bias for ALL timesteps: (T*Bp, 4H) f32.
    # Layer 0 reads the (feature-padded) input; layers 1-2 read the previous
    # layer's activations left in VMEM scratch.
    @pl.when(layer == 0)
    def _():
        gx_scr[...] = jnp.dot(x_ref[...], wih,
                              preferred_element_type=jnp.float32) + bias

    @pl.when(layer != 0)
    def _():
        gx_scr[...] = jnp.dot(act_scr[...], wih,
                              preferred_element_type=jnp.float32) + bias

    whh = whh_ref[...]       # (H, 4H) bf16, resident across the time loop

    def step(t, carry):
        h, c = carry
        base = pl.multiple_of(t * Bp, Bp)  # sublane-aligned row offset
        gates = gx_scr[pl.ds(base, Bp), :] + jnp.dot(
            h.astype(jnp.bfloat16), whh,
            preferred_element_type=jnp.float32)          # (Bp, 4H) f32
        # sigmoid(x) = 0.5*tanh(0.5*x) + 0.5 -> one wide EUP tanh for (i,f,o).
        s = 0.5 * jnp.tanh(0.5 * gates[:, :3 * H]) + 0.5
        i_g = s[:, 0 * H:1 * H]
        f_g = s[:, 1 * H:2 * H]
        o_g = s[:, 2 * H:3 * H]
        g_g = jnp.tanh(gates[:, 3 * H:4 * H])
        c_new = f_g * c + i_g * g_g
        h_new = o_g * jnp.tanh(c_new)
        act_scr[pl.ds(base, Bp), :] = h_new.astype(act_scr.dtype)
        return h_new, c_new

    init = (jnp.zeros((Bp, H), jnp.float32),
            jnp.zeros((Bp, H), jnp.float32))
    h_last, _ = lax.fori_loop(0, T, step, init, unroll=min(T, 8))

    # FC head: Linear -> ReLU -> (Dropout = identity) -> Linear -> ReLU
    @pl.when(layer == last_layer)
    def _():
        fc1 = jnp.dot(h_last, fw1_ref[...],
                      preferred_element_type=jnp.float32) + fb1_ref[...]
        fc1 = jnp.maximum(fc1, 0.0)
        # TODO(synk): nn.Dropout is treated as identity (inference/eval mode).
        fc2 = jnp.dot(fc1, fw2_ref[...],
                      preferred_element_type=jnp.float32) + fb2_ref[...]
        out_ref[...] = jnp.maximum(fc2, 0.0).astype(out_ref.dtype)


# ----------------------------------------------------------------------------
# Parameters: PyTorch-equivalent random init, then pre-packed for the kernel
# (transposed, gate-reordered to (i,f,o,g), layer-stacked, bf16 weights,
#  lane-padded FC head).
# ----------------------------------------------------------------------------
def init_params(key, input_size, hidden_size, output_size, num_layers=3):
    H = hidden_size
    assert H % 128 == 0, "hidden_size must be a multiple of 128 for this kernel"
    H2 = H // 2
    H2p = max(128, ((H2 + 127) // 128) * 128)
    Op = max(128, ((output_size + 127) // 128) * 128)

    def reorder_gates(w):  # columns (i|f|g|o) -> (i|f|o|g)
        return jnp.concatenate(
            [w[..., :2 * H], w[..., 3 * H:4 * H], w[..., 2 * H:3 * H]], axis=-1)

    k = 1.0 / math.sqrt(H)
    keys = jax.random.split(key, num_layers * 4 + 4)
    ki = 0
    wih_list, whh_list, b_list = [], [], []
    for layer in range(num_layers):
        in_sz = input_size if layer == 0 else H
        w_ih = jax.random.uniform(keys[ki + 0], (4 * H, in_sz), jnp.float32, -k, k)
        w_hh = jax.random.uniform(keys[ki + 1], (4 * H, H), jnp.float32, -k, k)
        b_ih = jax.random.uniform(keys[ki + 2], (4 * H,), jnp.float32, -k, k)
        b_hh = jax.random.uniform(keys[ki + 3], (4 * H,), jnp.float32, -k, k)
        ki += 4
        wih_t = reorder_gates(w_ih.T)                       # (in_sz, 4H)
        if in_sz < H:                                       # pad layer-0 K to H
            wih_t = jnp.pad(wih_t, ((0, H - in_sz), (0, 0)))
        whh_t = reorder_gates(w_hh.T)                       # (H, 4H)
        b = reorder_gates((b_ih + b_hh).reshape(1, 4 * H))  # combined bias
        wih_list.append(wih_t.astype(jnp.bfloat16))
        whh_list.append(whh_t.astype(jnp.bfloat16))
        b_list.append(b)

    params = {
        "wih": jnp.stack(wih_list),   # (3, H, 4H)  bf16
        "whh": jnp.stack(whh_list),   # (3, H, 4H)  bf16
        "b": jnp.stack(b_list),       # (3, 1, 4H)  f32
    }

    k1 = 1.0 / math.sqrt(H)
    k2 = 1.0 / math.sqrt(H2)
    fw1 = jax.random.uniform(keys[ki + 0], (H2, H), jnp.float32, -k1, k1).T   # (H, H2)
    fb1 = jax.random.uniform(keys[ki + 1], (1, H2), jnp.float32, -k1, k1)
    fw2 = jax.random.uniform(keys[ki + 2], (output_size, H2), jnp.float32, -k2, k2).T
    fb2 = jax.random.uniform(keys[ki + 3], (1, output_size), jnp.float32, -k2, k2)
    params["fw1"] = jnp.pad(fw1, ((0, 0), (0, H2p - H2)))              # (H, H2p)
    params["fb1"] = jnp.pad(fb1, ((0, 0), (0, H2p - H2)))              # (1, H2p)
    params["fw2"] = jnp.pad(fw2, ((0, H2p - H2), (0, Op - output_size)))  # (H2p, Op)
    params["fb2"] = jnp.pad(fb2, ((0, 0), (0, Op - output_size)))      # (1, Op)
    return params


# ----------------------------------------------------------------------------
# Full forward (single pallas_call, grid over the 3 LSTM layers)
# ----------------------------------------------------------------------------
@functools.partial(jax.jit, static_argnames=("output_size",))
def base_model_forward(params, x_bti, *, output_size):
    """x_bti: (B, T, I) as in the batch_first PyTorch module."""
    B, T, I = x_bti.shape
    H = params["whh"].shape[1]
    H2p = params["fw1"].shape[1]
    Op = params["fw2"].shape[1]
    assert I <= H

    # Pad batch to a full sublane (>= 8) and input features to H (zero rows in
    # the padded layer-0 w_ih make the extra columns inert).
    Bp = max(8, ((B + 7) // 8) * 8)
    x = x_bti.astype(jnp.float32)
    if (Bp - B) or (H - I):
        x = jnp.pad(x, ((0, Bp - B), (0, 0), (0, H - I)))
    # Time-major, flattened (T*Bp, H) rows; bf16 halves input DMA and feeds the
    # bf16 projection matmul directly.
    x2d = jnp.transpose(x, (1, 0, 2)).reshape(T * Bp, H).astype(jnp.bfloat16)

    # Conservative scoped-VMEM request (scratch + double-buffered weights),
    # clamped so it is valid on v5e/v6e/v7x alike.
    vmem_bytes = (
        T * Bp * 4 * H * 4            # gx_scr (f32)
        + T * Bp * H * 2              # act_scr (bf16)
        + T * Bp * H * 2              # x2d (bf16)
        + 2 * (2 * H * 4 * H * 2 + 4 * H * 4)   # double-buffered layer weights + bias
        + (H * H2p + H2p * Op + H2p + Op + Bp * Op) * 4)
    vmem_limit = min(max(2 * vmem_bytes, 16 * 1024 * 1024), 32 * 1024 * 1024)

    kernel = functools.partial(_fused_lstm_mlp_kernel, T, Bp)

    # TODO(synk): on v7x (2 TensorCores) split Bp across cores with an extra
    # "parallel" batch grid axis once B >= 16; at these sizes one core is used.
    out = pl.pallas_call(
        kernel,
        out_shape=jax.ShapeDtypeStruct((Bp, Op), jnp.float32),
        grid_spec=pltpu.PrefetchScalarGridSpec(
            num_scalar_prefetch=0,
            grid=(3,),
            in_specs=[
                pl.BlockSpec((T * Bp, H), lambda l: (0, 0)),        # x (fetched once)
                pl.BlockSpec((None, H, 4 * H), lambda l: (l, 0, 0)),  # w_ih[l]
                pl.BlockSpec((None, H, 4 * H), lambda l: (l, 0, 0)),  # w_hh[l]
                pl.BlockSpec((None, 1, 4 * H), lambda l: (l, 0, 0)),  # bias[l]
                pl.BlockSpec((H, H2p), lambda l: (0, 0)),           # fc1 W
                pl.BlockSpec((1, H2p), lambda l: (0, 0)),           # fc1 b
                pl.BlockSpec((H2p, Op), lambda l: (0, 0)),          # fc2 W
                pl.BlockSpec((1, Op), lambda l: (0, 0)),            # fc2 b
            ],
            out_specs=pl.BlockSpec((Bp, Op), lambda l: (0, 0)),
            scratch_shapes=[
                pltpu.VMEM((T * Bp, 4 * H), jnp.float32),   # hoisted x-projection
                pltpu.VMEM((T * Bp, H), jnp.bfloat16),      # inter-layer activations
            ],
        ),
        compiler_params=pltpu.CompilerParams(
            dimension_semantics=("arbitrary",),
            vmem_limit_bytes=int(vmem_limit)),
    )(x2d,
      params["wih"], params["whh"], params["b"],
      params["fw1"], params["fb1"], params["fw2"], params["fb2"])

    out = out[:B, :output_size]
    # .squeeze(1): no-op unless output_size == 1
    if output_size == 1:
        out = out[:, 0]
    return out


if __name__ == "__main__":
    # Small shapes consistent with the module's forward (B, T, input_size).
    B, T, INPUT, HIDDEN, OUTPUT = 4, 8, 5, 128, 21

    key = jax.random.PRNGKey(0)
    pkey, xkey = jax.random.split(key)
    params = init_params(pkey, INPUT, HIDDEN, OUTPUT)
    x = jax.random.normal(xkey, (B, T, INPUT), jnp.float32)

    out = base_model_forward(params, x, output_size=OUTPUT)
    out = jax.block_until_ready(out)
    assert out.shape == (B, OUTPUT), out.shape
    assert bool(jnp.all(out >= 0.0)), "ReLU output must be non-negative"
    assert bool(jnp.all(jnp.isfinite(out))), "output must be finite"
    print("KERNEL_OK")
</pallas_src>

<mosaic_0001>
module attributes {stable_mosaic.version = 11 : i64} {
  func.func @_fused_lstm_mlp_kernel(%arg0: i32, %arg1: memref<64x128xbf16, #tpu.memory_space<vmem>>, %arg2: memref<1x128x512xbf16, #tpu.memory_space<vmem>>, %arg3: memref<1x128x512xbf16, #tpu.memory_space<vmem>>, %arg4: memref<1x1x512xf32, #tpu.memory_space<vmem>>, %arg5: memref<128x128xf32, #tpu.memory_space<vmem>>, %arg6: memref<1x128xf32, #tpu.memory_space<vmem>>, %arg7: memref<128x128xf32, #tpu.memory_space<vmem>>, %arg8: memref<1x128xf32, #tpu.memory_space<vmem>>, %arg9: memref<8x128xf32, #tpu.memory_space<vmem>>, %arg10: memref<64x512xf32, #tpu.memory_space<vmem>>, %arg11: memref<64x128xbf16, #tpu.memory_space<vmem>>) attributes {dimension_semantics = [#tpu.dimension_semantics<arbitrary>], iteration_bounds = array<i64: 3>, scalar_prefetch = 0 : i64, scratch_operands = 2 : i64, tpu.core_type = #tpu.core_type<tc>, window_params = [{pipeline_mode = #tpu.pipeline_mode<synchronous>, transform_indices = @transform_0, window_bounds = array<i64: 64, 128>}, {transform_indices = @transform_1, window_bounds = array<i64: 1, 128, 512>}, {transform_indices = @transform_2, window_bounds = array<i64: 1, 128, 512>}, {transform_indices = @transform_3, window_bounds = array<i64: 1, 1, 512>}, {pipeline_mode = #tpu.pipeline_mode<synchronous>, transform_indices = @transform_4, window_bounds = array<i64: 128, 128>}, {pipeline_mode = #tpu.pipeline_mode<synchronous>, transform_indices = @transform_5, window_bounds = array<i64: 1, 128>}, {pipeline_mode = #tpu.pipeline_mode<synchronous>, transform_indices = @transform_6, window_bounds = array<i64: 128, 128>}, {pipeline_mode = #tpu.pipeline_mode<synchronous>, transform_indices = @transform_7, window_bounds = array<i64: 1, 128>}, {pipeline_mode = #tpu.pipeline_mode<synchronous>, transform_indices = @transform_8, window_bounds = array<i64: 8, 128>}]} {
    %c0 = arith.constant 0 : index
    %c0_0 = arith.constant 0 : index
    %c0_1 = arith.constant 0 : index
    %0 = vector.load %arg2[%c0, %c0_0, %c0_1] : memref<1x128x512xbf16, #tpu.memory_space<vmem>>, vector<1x128x512xbf16>
    %1 = vector.shape_cast %0 : vector<1x128x512xbf16> to vector<128x512xbf16>
    %c0_2 = arith.constant 0 : index
    %c0_3 = arith.constant 0 : index
    %c0_4 = arith.constant 0 : index
    %2 = vector.load %arg4[%c0_2, %c0_3, %c0_4] : memref<1x1x512xf32, #tpu.memory_space<vmem>>, vector<1x1x512xf32>
    %3 = vector.shape_cast %2 : vector<1x1x512xf32> to vector<1x512xf32>
    %c0_i32 = arith.constant 0 : i32
    %4 = arith.cmpi eq, %arg0, %c0_i32 : i32
    %5 = arith.extui %4 : i1 to i32
    %c0_i32_5 = arith.constant 0 : i32
    %6 = arith.cmpi ne, %5, %c0_i32_5 : i32
    scf.if %6 {
      %c0_71 = arith.constant 0 : index
      %c0_72 = arith.constant 0 : index
      %241 = vector.load %arg1[%c0_71, %c0_72] : memref<64x128xbf16, #tpu.memory_space<vmem>>, vector<64x128xbf16>
      %cst_73 = arith.constant dense<0.000000e+00> : vector<64x512xf32>
      %242 = tpu.matmul %241, %1, %cst_73 {dimension_numbers = #tpu.dot_dimension_numbers<[1], [0], [0], [1], [0, 0, 1, 1], [], []>} : vector<64x128xbf16>, vector<128x512xbf16>, vector<64x512xf32> -> vector<64x512xf32>
      %243 = vector.broadcast %3 : vector<1x512xf32> to vector<64x512xf32>
      %244 = arith.addf %242, %243 : vector<64x512xf32>
      %c0_74 = arith.constant 0 : index
      %c0_75 = arith.constant 0 : index
      %245 = vector.load %arg10[%c0_74, %c0_75] : memref<64x512xf32, #tpu.memory_space<vmem>>, vector<64x512xf32>
      tpu.vector_store %arg10[%c0_74, %c0_75], %244 {strides = array<i32>} : memref<64x512xf32, #tpu.memory_space<vmem>>, vector<64x512xf32>,
    } else {
    }
    %c0_i32_6 = arith.constant 0 : i32
    %7 = arith.cmpi ne, %arg0, %c0_i32_6 : i32
    %8 = arith.extui %7 : i1 to i32
    %c0_i32_7 = arith.constant 0 : i32
    %9 = arith.cmpi ne, %8, %c0_i32_7 : i32
    scf.if %9 {
      %c0_71 = arith.constant 0 : index
      %c0_72 = arith.constant 0 : index
      %241 = vector.load %arg11[%c0_71, %c0_72] : memref<64x128xbf16, #tpu.memory_space<vmem>>, vector<64x128xbf16>
      %cst_73 = arith.constant dense<0.000000e+00> : vector<64x512xf32>
      %242 = tpu.matmul %241, %1, %cst_73 {dimension_numbers = #tpu.dot_dimension_numbers<[1], [0], [0], [1], [0, 0, 1, 1], [], []>} : vector<64x128xbf16>, vector<128x512xbf16>, vector<64x512xf32> -> vector<64x512xf32>
      %243 = vector.broadcast %3 : vector<1x512xf32> to vector<64x512xf32>
      %244 = arith.addf %242, %243 : vector<64x512xf32>
      %c0_74 = arith.constant 0 : index
      %c0_75 = arith.constant 0 : index
      %245 = vector.load %arg10[%c0_74, %c0_75] : memref<64x512xf32, #tpu.memory_space<vmem>>, vector<64x512xf32>
      tpu.vector_store %arg10[%c0_74, %c0_75], %244 {strides = array<i32>} : memref<64x512xf32, #tpu.memory_space<vmem>>, vector<64x512xf32>,
    } else {
    }
    %c0_8 = arith.constant 0 : index
    %c0_9 = arith.constant 0 : index
    %c0_10 = arith.constant 0 : index
    %10 = vector.load %arg3[%c0_8, %c0_9, %c0_10] : memref<1x128x512xbf16, #tpu.memory_space<vmem>>, vector<1x128x512xbf16>
    %11 = vector.shape_cast %10 : vector<1x128x512xbf16> to vector<128x512xbf16>
    %cst = arith.constant 0.000000e+00 : f32
    %12 = vector.broadcast %cst : f32 to vector<8x128xf32>
    %cst_11 = arith.constant 0.000000e+00 : f32
    %13 = vector.broadcast %cst_11 : f32 to vector<8x128xf32>
    %c0_i32_12 = arith.constant 0 : i32
    %c8_i32 = arith.constant 8 : i32
    %14 = arith.muli %c0_i32_12, %c8_i32 : i32
    %15 = tpu.assume_multiple %14, 8 : i32
    %16 = arith.index_cast %15 : i32 to index
    %c0_13 = arith.constant 0 : index
    %17 = vector.load %arg10[%16, %c0_13] : memref<64x512xf32, #tpu.memory_space<vmem>>, vector<8x512xf32>
    %18 = arith.truncf %12 : vector<8x128xf32> to vector<8x128xbf16>
    %cst_14 = arith.constant dense<0.000000e+00> : vector<8x512xf32>
    %19 = tpu.matmul %18, %11, %cst_14 {dimension_numbers = #tpu.dot_dimension_numbers<[1], [0], [0], [1], [0, 0, 1, 1], [], []>} : vector<8x128xbf16>, vector<128x512xbf16>, vector<8x512xf32> -> vector<8x512xf32>
    %20 = arith.addf %17, %19 : vector<8x512xf32>
    %21 = vector.extract_strided_slice %20 {offsets = [0, 0], sizes = [8, 384], strides = [1, 1]} : vector<8x512xf32> to vector<8x384xf32>
    %cst_15 = arith.constant 5.000000e-01 : f32
    %22 = vector.broadcast %cst_15 : f32 to vector<8x384xf32>
    %23 = arith.mulf %22, %21 : vector<8x384xf32>
    %24 = math.tanh %23 : vector<8x384xf32>
    %cst_16 = arith.constant 5.000000e-01 : f32
    %25 = vector.broadcast %cst_16 : f32 to vector<8x384xf32>
    %26 = arith.mulf %25, %24 : vector<8x384xf32>
    %cst_17 = arith.constant 5.000000e-01 : f32
    %27 = vector.broadcast %cst_17 : f32 to vector<8x384xf32>
    %28 = arith.addf %26, %27 : vector<8x384xf32>
    %29 = vector.extract_strided_slice %28 {offsets = [0, 0], sizes = [8, 128], strides = [1, 1]} : vector<8x384xf32> to vector<8x128xf32>
    %30 = vector.extract_strided_slice %28 {offsets = [0, 128], sizes = [8, 128], strides = [1, 1]} : vector<8x384xf32> to vector<8x128xf32>
    %31 = vector.extract_strided_slice %28 {offsets = [0, 256], sizes = [8, 128], strides = [1, 1]} : vector<8x384xf32> to vector<8x128xf32>
    %32 = vector.extract_strided_slice %20 {offsets = [0, 384], sizes = [8, 128], strides = [1, 1]} : vector<8x512xf32> to vector<8x128xf32>
    %33 = math.tanh %32 : vector<8x128xf32>
    %34 = arith.mulf %30, %13 : vector<8x128xf32>
    %35 = arith.mulf %29, %33 : vector<8x128xf32>
    %36 = arith.addf %34, %35 : vector<8x128xf32>
    %37 = math.tanh %36 : vector<8x128xf32>
    %38 = arith.mulf %31, %37 : vector<8x128xf32>
    %39 = arith.truncf %38 : vector<8x128xf32> to vector<8x128xbf16>
    %40 = arith.index_cast %15 : i32 to index
    %c0_18 = arith.constant 0 : index
    %41 = vector.load %arg11[%40, %c0_18] : memref<64x128xbf16, #tpu.memory_space<vmem>>, vector<8x128xbf16>
    tpu.vector_store %arg11[%40, %c0_18], %39 {strides = array<i32>} : memref<64x128xbf16, #tpu.memory_space<vmem>>, vector<8x128xbf16>,
    %c1_i32 = arith.constant 1 : i32
    %c8_i32_19 = arith.constant 8 : i32
    %42 = arith.muli %c1_i32, %c8_i32_19 : i32
    %43 = tpu.assume_multiple %42, 8 : i32
    %44 = arith.index_cast %43 : i32 to index
    %c0_20 = arith.constant 0 : index
    %45 = vector.load %arg10[%44, %c0_20] : memref<64x512xf32, #tpu.memory_space<vmem>>, vector<8x512xf32>
    %46 = arith.truncf %38 : vector<8x128xf32> to vector<8x128xbf16>
    %cst_21 = arith.constant dense<0.000000e+00> : vector<8x512xf32>
    %47 = tpu.matmul %46, %11, %cst_21 {dimension_numbers = #tpu.dot_dimension_numbers<[1], [0], [0], [1], [0, 0, 1, 1], [], []>} : vector<8x128xbf16>, vector<128x512xbf16>, vector<8x512xf32> -> vector<8x512xf32>
    %48 = arith.addf %45, %47 : vector<8x512xf32>
    %49 = vector.extract_strided_slice %48 {offsets = [0, 0], sizes = [8, 384], strides = [1, 1]} : vector<8x512xf32> to vector<8x384xf32>
    %cst_22 = arith.constant 5.000000e-01 : f32
    %50 = vector.broadcast %cst_22 : f32 to vector<8x384xf32>
    %51 = arith.mulf %50, %49 : vector<8x384xf32>
    %52 = math.tanh %51 : vector<8x384xf32>
    %cst_23 = arith.constant 5.000000e-01 : f32
    %53 = vector.broadcast %cst_23 : f32 to vector<8x384xf32>
    %54 = arith.mulf %53, %52 : vector<8x384xf32>
    %cst_24 = arith.constant 5.000000e-01 : f32
    %55 = vector.broadcast %cst_24 : f32 to vector<8x384xf32>
    %56 = arith.addf %54, %55 : vector<8x384xf32>
    %57 = vector.extract_strided_slice %56 {offsets = [0, 0], sizes = [8, 128], strides = [1, 1]} : vector<8x384xf32> to vector<8x128xf32>
    %58 = vector.extract_strided_slice %56 {offsets = [0, 128], sizes = [8, 128], strides = [1, 1]} : vector<8x384xf32> to vector<8x128xf32>
    %59 = vector.extract_strided_slice %56 {offsets = [0, 256], sizes = [8, 128], strides = [1, 1]} : vector<8x384xf32> to vector<8x128xf32>
    %60 = vector.extract_strided_slice %48 {offsets = [0, 384], sizes = [8, 128], strides = [1, 1]} : vector<8x512xf32> to vector<8x128xf32>
    %61 = math.tanh %60 : vector<8x128xf32>
    %62 = arith.mulf %58, %36 : vector<8x128xf32>
    %63 = arith.mulf %57, %61 : vector<8x128xf32>
    %64 = arith.addf %62, %63 : vector<8x128xf32>
    %65 = math.tanh %64 : vector<8x128xf32>
    %66 = arith.mulf %59, %65 : vector<8x128xf32>
    %67 = arith.truncf %66 : vector<8x128xf32> to vector<8x128xbf16>
    %68 = arith.index_cast %43 : i32 to index
    %c0_25 = arith.constant 0 : index
    %69 = vector.load %arg11[%68, %c0_25] : memref<64x128xbf16, #tpu.memory_space<vmem>>, vector<8x128xbf16>
    tpu.vector_store %arg11[%68, %c0_25], %67 {strides = array<i32>} : memref<64x128xbf16, #tpu.memory_space<vmem>>, vector<8x128xbf16>,
    %c2_i32 = arith.constant 2 : i32
    %c8_i32_26 = arith.constant 8 : i32
    %70 = arith.muli %c2_i32, %c8_i32_26 : i32
    %71 = tpu.assume_multiple %70, 8 : i32
    %72 = arith.index_cast %71 : i32 to index
    %c0_27 = arith.constant 0 : index
    %73 = vector.load %arg10[%72, %c0_27] : memref<64x512xf32, #tpu.memory_space<vmem>>, vector<8x512xf32>
    %74 = arith.truncf %66 : vector<8x128xf32> to vector<8x128xbf16>
    %cst_28 = arith.constant dense<0.000000e+00> : vector<8x512xf32>
    %75 = tpu.matmul %74, %11, %cst_28 {dimension_numbers = #tpu.dot_dimension_numbers<[1], [0], [0], [1], [0, 0, 1, 1], [], []>} : vector<8x128xbf16>, vector<128x512xbf16>, vector<8x512xf32> -> vector<8x512xf32>
    %76 = arith.addf %73, %75 : vector<8x512xf32>
    %77 = vector.extract_strided_slice %76 {offsets = [0, 0], sizes = [8, 384], strides = [1, 1]} : vector<8x512xf32> to vector<8x384xf32>
    %cst_29 = arith.constant 5.000000e-01 : f32
    %78 = vector.broadcast %cst_29 : f32 to vector<8x384xf32>
    %79 = arith.mulf %78, %77 : vector<8x384xf32>
    %80 = math.tanh %79 : vector<8x384xf32>
    %cst_30 = arith.constant 5.000000e-01 : f32
    %81 = vector.broadcast %cst_30 : f32 to vector<8x384xf32>
    %82 = arith.mulf %81, %80 : vector<8x384xf32>
    %cst_31 = arith.constant 5.000000e-01 : f32
    %83 = vector.broadcast %cst_31 : f32 to vector<8x384xf32>
    %84 = arith.addf %82, %83 : vector<8x384xf32>
    %85 = vector.extract_strided_slice %84 {offsets = [0, 0], sizes = [8, 128], strides = [1, 1]} : vector<8x384xf32> to vector<8x128xf32>
    %86 = vector.extract_strided_slice %84 {offsets = [0, 128], sizes = [8, 128], strides = [1, 1]} : vector<8x384xf32> to vector<8x128xf32>
    %87 = vector.extract_strided_slice %84 {offsets = [0, 256], sizes = [8, 128], strides = [1, 1]} : vector<8x384xf32> to vector<8x128xf32>
    %88 = vector.extract_strided_slice %76 {offsets = [0, 384], sizes = [8, 128], strides = [1, 1]} : vector<8x512xf32> to vector<8x128xf32>
    %89 = math.tanh %88 : vector<8x128xf32>
    %90 = arith.mulf %86, %64 : vector<8x128xf32>
    %91 = arith.mulf %85, %89 : vector<8x128xf32>
    %92 = arith.addf %90, %91 : vector<8x128xf32>
    %93 = math.tanh %92 : vector<8x128xf32>
    %94 = arith.mulf %87, %93 : vector<8x128xf32>
    %95 = arith.truncf %94 : vector<8x128xf32> to vector<8x128xbf16>
    %96 = arith.index_cast %71 : i32 to index
    %c0_32 = arith.constant 0 : index
    %97 = vector.load %arg11[%96, %c0_32] : memref<64x128xbf16, #tpu.memory_space<vmem>>, vector<8x128xbf16>
    tpu.vector_store %arg11[%96, %c0_32], %95 {strides = array<i32>} : memref<64x128xbf16, #tpu.memory_space<vmem>>, vector<8x128xbf16>,
    %c3_i32 = arith.constant 3 : i32
    %c8_i32_33 = arith.constant 8 : i32
    %98 = arith.muli %c3_i32, %c8_i32_33 : i32
    %99 = tpu.assume_multiple %98, 8 : i32
    %100 = arith.index_cast %99 : i32 to index
    %c0_34 = arith.constant 0 : index
    %101 = vector.load %arg10[%100, %c0_34] : memref<64x512xf32, #tpu.memory_space<vmem>>, vector<8x512xf32>
    %102 = arith.truncf %94 : vector<8x128xf32> to vector<8x128xbf16>
    %cst_35 = arith.constant dense<0.000000e+00> : vector<8x512xf32>
    %103 = tpu.matmul %102, %11, %cst_35 {dimension_numbers = #tpu.dot_dimension_numbers<[1], [0], [0], [1], [0, 0, 1, 1], [], []>} : vector<8x128xbf16>, vector<128x512xbf16>, vector<8x512xf32> -> vector<8x512xf32>
    %104 = arith.addf %101, %103 : vector<8x512xf32>
    %105 = vector.extract_strided_slice %104 {offsets = [0, 0], sizes = [8, 384], strides = [1, 1]} : vector<8x512xf32> to vector<8x384xf32>
    %cst_36 = arith.constant 5.000000e-01 : f32
    %106 = vector.broadcast %cst_36 : f32 to vector<8x384xf32>
    %107 = arith.mulf %106, %105 : vector<8x384xf32>
    %108 = math.tanh %107 : vector<8x384xf32>
    %cst_37 = arith.constant 5.000000e-01 : f32
    %109 = vector.broadcast %cst_37 : f32 to vector<8x384xf32>
    %110 = arith.mulf %109, %108 : vector<8x384xf32>
    %cst_38 = arith.constant 5.000000e-01 : f32
    %111 = vector.broadcast %cst_38 : f32 to vector<8x384xf32>
    %112 = arith.addf %110, %111 : vector<8x384xf32>
    %113 = vector.extract_strided_slice %112 {offsets = [0, 0], sizes = [8, 128], strides = [1, 1]} : vector<8x384xf32> to vector<8x128xf32>
    %114 = vector.extract_strided_slice %112 {offsets = [0, 128], sizes = [8, 128], strides = [1, 1]} : vector<8x384xf32> to vector<8x128xf32>
    %115 = vector.extract_strided_slice %112 {offsets = [0, 256], sizes = [8, 128], strides = [1, 1]} : vector<8x384xf32> to vector<8x128xf32>
    %116 = vector.extract_strided_slice %104 {offsets = [0, 384], sizes = [8, 128], strides = [1, 1]} : vector<8x512xf32> to vector<8x128xf32>
    %117 = math.tanh %116 : vector<8x128xf32>
    %118 = arith.mulf %114, %92 : vector<8x128xf32>
    %119 = arith.mulf %113, %117 : vector<8x128xf32>
    %120 = arith.addf %118, %119 : vector<8x128xf32>
    %121 = math.tanh %120 : vector<8x128xf32>
    %122 = arith.mulf %115, %121 : vector<8x128xf32>
    %123 = arith.truncf %122 : vector<8x128xf32> to vector<8x128xbf16>
    %124 = arith.index_cast %99 : i32 to index
    %c0_39 = arith.constant 0 : index
    %125 = vector.load %arg11[%124, %c0_39] : memref<64x128xbf16, #tpu.memory_space<vmem>>, vector<8x128xbf16>
    tpu.vector_store %arg11[%124, %c0_39], %123 {strides = array<i32>} : memref<64x128xbf16, #tpu.memory_space<vmem>>, vector<8x128xbf16>,
    %c4_i32 = arith.constant 4 : i32
    %c8_i32_40 = arith.constant 8 : i32
    %126 = arith.muli %c4_i32, %c8_i32_40 : i32
    %127 = tpu.assume_multiple %126, 8 : i32
    %128 = arith.index_cast %127 : i32 to index
    %c0_41 = arith.constant 0 : index
    %129 = vector.load %arg10[%128, %c0_41] : memref<64x512xf32, #tpu.memory_space<vmem>>, vector<8x512xf32>
    %130 = arith.truncf %122 : vector<8x128xf32> to vector<8x128xbf16>
    %cst_42 = arith.constant dense<0.000000e+00> : vector<8x512xf32>
    %131 = tpu.matmul %130, %11, %cst_42 {dimension_numbers = #tpu.dot_dimension_numbers<[1], [0], [0], [1], [0, 0, 1, 1], [], []>} : vector<8x128xbf16>, vector<128x512xbf16>, vector<8x512xf32> -> vector<8x512xf32>
    %132 = arith.addf %129, %131 : vector<8x512xf32>
    %133 = vector.extract_strided_slice %132 {offsets = [0, 0], sizes = [8, 384], strides = [1, 1]} : vector<8x512xf32> to vector<8x384xf32>
    %cst_43 = arith.constant 5.000000e-01 : f32
    %134 = vector.broadcast %cst_43 : f32 to vector<8x384xf32>
    %135 = arith.mulf %134, %133 : vector<8x384xf32>
    %136 = math.tanh %135 : vector<8x384xf32>
    %cst_44 = arith.constant 5.000000e-01 : f32
    %137 = vector.broadcast %cst_44 : f32 to vector<8x384xf32>
    %138 = arith.mulf %137, %136 : vector<8x384xf32>
    %cst_45 = arith.constant 5.000000e-01 : f32
    %139 = vector.broadcast %cst_45 : f32 to vector<8x384xf32>
    %140 = arith.addf %138, %139 : vector<8x384xf32>
    %141 = vector.extract_strided_slice %140 {offsets = [0, 0], sizes = [8, 128], strides = [1, 1]} : vector<8x384xf32> to vector<8x128xf32>
    %142 = vector.extract_strided_slice %140 {offsets = [0, 128], sizes = [8, 128], strides = [1, 1]} : vector<8x384xf32> to vector<8x128xf32>
    %143 = vector.extract_strided_slice %140 {offsets = [0, 256], sizes = [8, 128], strides = [1, 1]} : vector<8x384xf32> to vector<8x128xf32>
    %144 = vector.extract_strided_slice %132 {offsets = [0, 384], sizes = [8, 128], strides = [1, 1]} : vector<8x512xf32> to vector<8x128xf32>
    %145 = math.tanh %144 : vector<8x128xf32>
    %146 = arith.mulf %142, %120 : vector<8x128xf32>
    %147 = arith.mulf %141, %145 : vector<8x128xf32>
    %148 = arith.addf %146, %147 : vector<8x128xf32>
    %149 = math.tanh %148 : vector<8x128xf32>
    %150 = arith.mulf %143, %149 : vector<8x128xf32>
    %151 = arith.truncf %150 : vector<8x128xf32> to vector<8x128xbf16>
    %152 = arith.index_cast %127 : i32 to index
    %c0_46 = arith.constant 0 : index
    %153 = vector.load %arg11[%152, %c0_46] : memref<64x128xbf16, #tpu.memory_space<vmem>>, vector<8x128xbf16>
    tpu.vector_store %arg11[%152, %c0_46], %151 {strides = array<i32>} : memref<64x128xbf16, #tpu.memory_space<vmem>>, vector<8x128xbf16>,
    %c5_i32 = arith.constant 5 : i32
    %c8_i32_47 = arith.constant 8 : i32
    %154 = arith.muli %c5_i32, %c8_i32_47 : i32
    %155 = tpu.assume_multiple %154, 8 : i32
    %156 = arith.index_cast %155 : i32 to index
    %c0_48 = arith.constant 0 : index
    %157 = vector.load %arg10[%156, %c0_48] : memref<64x512xf32, #tpu.memory_space<vmem>>, vector<8x512xf32>
    %158 = arith.truncf %150 : vector<8x128xf32> to vector<8x128xbf16>
    %cst_49 = arith.constant dense<0.000000e+00> : vector<8x512xf32>
    %159 = tpu.matmul %158, %11, %cst_49 {dimension_numbers = #tpu.dot_dimension_numbers<[1], [0], [0], [1], [0, 0, 1, 1], [], []>} : vector<8x128xbf16>, vector<128x512xbf16>, vector<8x512xf32> -> vector<8x512xf32>
    %160 = arith.addf %157, %159 : vector<8x512xf32>
    %161 = vector.extract_strided_slice %160 {offsets = [0, 0], sizes = [8, 384], strides = [1, 1]} : vector<8x512xf32> to vector<8x384xf32>
    %cst_50 = arith.constant 5.000000e-01 : f32
    %162 = vector.broadcast %cst_50 : f32 to vector<8x384xf32>
    %163 = arith.mulf %162, %161 : vector<8x384xf32>
    %164 = math.tanh %163 : vector<8x384xf32>
    %cst_51 = arith.constant 5.000000e-01 : f32
    %165 = vector.broadcast %cst_51 : f32 to vector<8x384xf32>
    %166 = arith.mulf %165, %164 : vector<8x384xf32>
    %cst_52 = arith.constant 5.000000e-01 : f32
    %167 = vector.broadcast %cst_52 : f32 to vector<8x384xf32>
    %168 = arith.addf %166, %167 : vector<8x384xf32>
    %169 = vector.extract_strided_slice %168 {offsets = [0, 0], sizes = [8, 128], strides = [1, 1]} : vector<8x384xf32> to vector<8x128xf32>
    %170 = vector.extract_strided_slice %168 {offsets = [0, 128], sizes = [8, 128], strides = [1, 1]} : vector<8x384xf32> to vector<8x128xf32>
    %171 = vector.extract_strided_slice %168 {offsets = [0, 256], sizes = [8, 128], strides = [1, 1]} : vector<8x384xf32> to vector<8x128xf32>
    %172 = vector.extract_strided_slice %160 {offsets = [0, 384], sizes = [8, 128], strides = [1, 1]} : vector<8x512xf32> to vector<8x128xf32>
    %173 = math.tanh %172 : vector<8x128xf32>
    %174 = arith.mulf %170, %148 : vector<8x128xf32>
    %175 = arith.mulf %169, %173 : vector<8x128xf32>
    %176 = arith.addf %174, %175 : vector<8x128xf32>
    %177 = math.tanh %176 : vector<8x128xf32>
    %178 = arith.mulf %171, %177 : vector<8x128xf32>
    %179 = arith.truncf %178 : vector<8x128xf32> to vector<8x128xbf16>
    %180 = arith.index_cast %155 : i32 to index
    %c0_53 = arith.constant 0 : index
    %181 = vector.load %arg11[%180, %c0_53] : memref<64x128xbf16, #tpu.memory_space<vmem>>, vector<8x128xbf16>
    tpu.vector_store %arg11[%180, %c0_53], %179 {strides = array<i32>} : memref<64x128xbf16, #tpu.memory_space<vmem>>, vector<8x128xbf16>,
    %c6_i32 = arith.constant 6 : i32
    %c8_i32_54 = arith.constant 8 : i32
    %182 = arith.muli %c6_i32, %c8_i32_54 : i32
    %183 = tpu.assume_multiple %182, 8 : i32
    %184 = arith.index_cast %183 : i32 to index
    %c0_55 = arith.constant 0 : index
    %185 = vector.load %arg10[%184, %c0_55] : memref<64x512xf32, #tpu.memory_space<vmem>>, vector<8x512xf32>
    %186 = arith.truncf %178 : vector<8x128xf32> to vector<8x128xbf16>
    %cst_56 = arith.constant dense<0.000000e+00> : vector<8x512xf32>
    %187 = tpu.matmul %186, %11, %cst_56 {dimension_numbers = #tpu.dot_dimension_numbers<[1], [0], [0], [1], [0, 0, 1, 1], [], []>} : vector<8x128xbf16>, vector<128x512xbf16>, vector<8x512xf32> -> vector<8x512xf32>
    %188 = arith.addf %185, %187 : vector<8x512xf32>
    %189 = vector.extract_strided_slice %188 {offsets = [0, 0], sizes = [8, 384], strides = [1, 1]} : vector<8x512xf32> to vector<8x384xf32>
    %cst_57 = arith.constant 5.000000e-01 : f32
    %190 = vector.broadcast %cst_57 : f32 to vector<8x384xf32>
    %191 = arith.mulf %190, %189 : vector<8x384xf32>
    %192 = math.tanh %191 : vector<8x384xf32>
    %cst_58 = arith.constant 5.000000e-01 : f32
    %193 = vector.broadcast %cst_58 : f32 to vector<8x384xf32>
    %194 = arith.mulf %193, %192 : vector<8x384xf32>
    %cst_59 = arith.constant 5.000000e-01 : f32
    %195 = vector.broadcast %cst_59 : f32 to vector<8x384xf32>
    %196 = arith.addf %194, %195 : vector<8x384xf32>
    %197 = vector.extract_strided_slice %196 {offsets = [0, 0], sizes = [8, 128], strides = [1, 1]} : vector<8x384xf32> to vector<8x128xf32>
    %198 = vector.extract_strided_slice %196 {offsets = [0, 128], sizes = [8, 128], strides = [1, 1]} : vector<8x384xf32> to vector<8x128xf32>
    %199 = vector.extract_strided_slice %196 {offsets = [0, 256], sizes = [8, 128], strides = [1, 1]} : vector<8x384xf32> to vector<8x128xf32>
    %200 = vector.extract_strided_slice %188 {offsets = [0, 384], sizes = [8, 128], strides = [1, 1]} : vector<8x512xf32> to vector<8x128xf32>
    %201 = math.tanh %200 : vector<8x128xf32>
    %202 = arith.mulf %198, %176 : vector<8x128xf32>
    %203 = arith.mulf %197, %201 : vector<8x128xf32>
    %204 = arith.addf %202, %203 : vector<8x128xf32>
    %205 = math.tanh %204 : vector<8x128xf32>
    %206 = arith.mulf %199, %205 : vector<8x128xf32>
    %207 = arith.truncf %206 : vector<8x128xf32> to vector<8x128xbf16>
    %208 = arith.index_cast %183 : i32 to index
    %c0_60 = arith.constant 0 : index
    %209 = vector.load %arg11[%208, %c0_60] : memref<64x128xbf16, #tpu.memory_space<vmem>>, vector<8x128xbf16>
    tpu.vector_store %arg11[%208, %c0_60], %207 {strides = array<i32>} : memref<64x128xbf16, #tpu.memory_space<vmem>>, vector<8x128xbf16>,
    %c7_i32 = arith.constant 7 : i32
    %c8_i32_61 = arith.constant 8 : i32
    %210 = arith.muli %c7_i32, %c8_i32_61 : i32
    %211 = tpu.assume_multiple %210, 8 : i32
    %212 = arith.index_cast %211 : i32 to index
    %c0_62 = arith.constant 0 : index
    %213 = vector.load %arg10[%212, %c0_62] : memref<64x512xf32, #tpu.memory_space<vmem>>, vector<8x512xf32>
    %214 = arith.truncf %206 : vector<8x128xf32> to vector<8x128xbf16>
    %cst_63 = arith.constant dense<0.000000e+00> : vector<8x512xf32>
    %215 = tpu.matmul %214, %11, %cst_63 {dimension_numbers = #tpu.dot_dimension_numbers<[1], [0], [0], [1], [0, 0, 1, 1], [], []>} : vector<8x128xbf16>, vector<128x512xbf16>, vector<8x512xf32> -> vector<8x512xf32>
    %216 = arith.addf %213, %215 : vector<8x512xf32>
    %217 = vector.extract_strided_slice %216 {offsets = [0, 0], sizes = [8, 384], strides = [1, 1]} : vector<8x512xf32> to vector<8x384xf32>
    %cst_64 = arith.constant 5.000000e-01 : f32
    %218 = vector.broadcast %cst_64 : f32 to vector<8x384xf32>
    %219 = arith.mulf %218, %217 : vector<8x384xf32>
    %220 = math.tanh %219 : vector<8x384xf32>
    %cst_65 = arith.constant 5.000000e-01 : f32
    %221 = vector.broadcast %cst_65 : f32 to vector<8x384xf32>
    %222 = arith.mulf %221, %220 : vector<8x384xf32>
    %cst_66 = arith.constant 5.000000e-01 : f32
    %223 = vector.broadcast %cst_66 : f32 to vector<8x384xf32>
    %224 = arith.addf %222, %223 : vector<8x384xf32>
    %225 = vector.extract_strided_slice %224 {offsets = [0, 0], sizes = [8, 128], strides = [1, 1]} : vector<8x384xf32> to vector<8x128xf32>
    %226 = vector.extract_strided_slice %224 {offsets = [0, 128], sizes = [8, 128], strides = [1, 1]} : vector<8x384xf32> to vector<8x128xf32>
    %227 = vector.extract_strided_slice %224 {offsets = [0, 256], sizes = [8, 128], strides = [1, 1]} : vector<8x384xf32> to vector<8x128xf32>
    %228 = vector.extract_strided_slice %216 {offsets = [0, 384], sizes = [8, 128], strides = [1, 1]} : vector<8x512xf32> to vector<8x128xf32>
    %229 = math.tanh %228 : vector<8x128xf32>
    %230 = arith.mulf %226, %204 : vector<8x128xf32>
    %231 = arith.mulf %225, %229 : vector<8x128xf32>
    %232 = arith.addf %230, %231 : vector<8x128xf32>
    %233 = math.tanh %232 : vector<8x128xf32>
    %234 = arith.mulf %227, %233 : vector<8x128xf32>
    %235 = arith.truncf %234 : vector<8x128xf32> to vector<8x128xbf16>
    %236 = arith.index_cast %211 : i32 to index
    %c0_67 = arith.constant 0 : index
    %237 = vector.load %arg11[%236, %c0_67] : memref<64x128xbf16, #tpu.memory_space<vmem>>, vector<8x128xbf16>
    tpu.vector_store %arg11[%236, %c0_67], %235 {strides = array<i32>} : memref<64x128xbf16, #tpu.memory_space<vmem>>, vector<8x128xbf16>,
    %c8_i32_68 = arith.constant 8 : i32
    %c2_i32_69 = arith.constant 2 : i32
    %238 = arith.cmpi eq, %arg0, %c2_i32_69 : i32
    %239 = arith.extui %238 : i1 to i32
    %c0_i32_70 = arith.constant 0 : i32
    %240 = arith.cmpi ne, %239, %c0_i32_70 : i32
    scf.if %240 {
      %c0_71 = arith.constant 0 : index
      %c0_72 = arith.constant 0 : index
      %241 = vector.load %arg5[%c0_71, %c0_72] : memref<128x128xf32, #tpu.memory_space<vmem>>, vector<128x128xf32>
      %cst_73 = arith.constant dense<0.000000e+00> : vector<8x128xf32>
      %242 = tpu.matmul %234, %241, %cst_73 {dimension_numbers = #tpu.dot_dimension_numbers<[1], [0], [0], [1], [0, 0, 1, 1], [], []>} : vector<8x128xf32>, vector<128x128xf32>, vector<8x128xf32> -> vector<8x128xf32>
      %c0_74 = arith.constant 0 : index
      %c0_75 = arith.constant 0 : index
      %243 = vector.load %arg6[%c0_74, %c0_75] : memref<1x128xf32, #tpu.memory_space<vmem>>, vector<1x128xf32>
      %244 = vector.broadcast %243 : vector<1x128xf32> to vector<8x128xf32>
      %245 = arith.addf %242, %244 : vector<8x128xf32>
      %cst_76 = arith.constant 0.000000e+00 : f32
      %246 = vector.broadcast %cst_76 : f32 to vector<8x128xf32>
      %247 = arith.maximumf %245, %246 : vector<8x128xf32>
      %c0_77 = arith.constant 0 : index
      %c0_78 = arith.constant 0 : index
      %248 = vector.load %arg7[%c0_77, %c0_78] : memref<128x128xf32, #tpu.memory_space<vmem>>, vector<128x128xf32>
      %cst_79 = arith.constant dense<0.000000e+00> : vector<8x128xf32>
      %249 = tpu.matmul %247, %248, %cst_79 {dimension_numbers = #tpu.dot_dimension_numbers<[1], [0], [0], [1], [0, 0, 1, 1], [], []>} : vector<8x128xf32>, vector<128x128xf32>, vector<8x128xf32> -> vector<8x128xf32>
      %c0_80 = arith.constant 0 : index
      %c0_81 = arith.constant 0 : index
      %250 = vector.load %arg8[%c0_80, %c0_81] : memref<1x128xf32, #tpu.memory_space<vmem>>, vector<1x128xf32>
      %251 = vector.broadcast %250 : vector<1x128xf32> to vector<8x128xf32>
      %252 = arith.addf %249, %251 : vector<8x128xf32>
      %cst_82 = arith.constant 0.000000e+00 : f32
      %253 = vector.broadcast %cst_82 : f32 to vector<8x128xf32>
      %254 = arith.maximumf %252, %253 : vector<8x128xf32>
      %c0_83 = arith.constant 0 : index
      %c0_84 = arith.constant 0 : index
      %255 = vector.load %arg9[%c0_83, %c0_84] : memref<8x128xf32, #tpu.memory_space<vmem>>, vector<8x128xf32>
      tpu.vector_store %arg9[%c0_83, %c0_84], %254 {strides = array<i32>} : memref<8x128xf32, #tpu.memory_space<vmem>>, vector<8x128xf32>,
    } else {
    }
    return
  }
  func.func @transform_0(%arg0: i32) -> (i32, i32) {
    %c0_i32 = arith.constant 0 : i32
    %c0_i32_0 = arith.constant 0 : i32
    %c0_i32_1 = arith.constant 0 : i32
    return %c0_i32, %c0_i32_0 : i32, i32
  }
  func.func @transform_1(%arg0: i32) -> (i32, i32, i32) {
    %c0_i32 = arith.constant 0 : i32
    %c0_i32_0 = arith.constant 0 : i32
    %c0_i32_1 = arith.constant 0 : i32
    return %arg0, %c0_i32, %c0_i32_0 : i32, i32, i32
  }
  func.func @transform_2(%arg0: i32) -> (i32, i32, i32) {
    %c0_i32 = arith.constant 0 : i32
    %c0_i32_0 = arith.constant 0 : i32
    %c0_i32_1 = arith.constant 0 : i32
    return %arg0, %c0_i32, %c0_i32_0 : i32, i32, i32
  }
  func.func @transform_3(%arg0: i32) -> (i32, i32, i32) {
    %c0_i32 = arith.constant 0 : i32
    %c0_i32_0 = arith.constant 0 : i32
    %c0_i32_1 = arith.constant 0 : i32
    return %arg0, %c0_i32, %c0_i32_0 : i32, i32, i32
  }
  func.func @transform_4(%arg0: i32) -> (i32, i32) {
    %c0_i32 = arith.constant 0 : i32
    %c0_i32_0 = arith.constant 0 : i32
    %c0_i32_1 = arith.constant 0 : i32
    return %c0_i32, %c0_i32_0 : i32, i32
  }
  func.func @transform_5(%arg0: i32) -> (i32, i32) {
    %c0_i32 = arith.constant 0 : i32
    %c0_i32_0 = arith.constant 0 : i32
    %c0_i32_1 = arith.constant 0 : i32
    return %c0_i32, %c0_i32_0 : i32, i32
  }
  func.func @transform_6(%arg0: i32) -> (i32, i32) {
    %c0_i32 = arith.constant 0 : i32
    %c0_i32_0 = arith.constant 0 : i32
    %c0_i32_1 = arith.constant 0 : i32
    return %c0_i32, %c0_i32_0 : i32, i32
  }
  func.func @transform_7(%arg0: i32) -> (i32, i32) {
    %c0_i32 = arith.constant 0 : i32
    %c0_i32_0 = arith.constant 0 : i32
    %c0_i32_1 = arith.constant 0 : i32
    return %c0_i32, %c0_i32_0 : i32, i32
  }
  func.func @transform_8(%arg0: i32) -> (i32, i32) {
    %c0_i32 = arith.constant 0 : i32
    %c0_i32_0 = arith.constant 0 : i32
    %c0_i32_1 = arith.constant 0 : i32
    return %c0_i32, %c0_i32_0 : i32, i32
  }
}

</mosaic_0001>

<bundles_post_ra>
// kernel: base_model_forward.1
= control target key start
LH: loop header
LB: loop body
LE: loop exit
PB: predicated region body
PF: predicated region fallthrough
CT: control target
= control target key end

     0   :  { %13 = vsyncpa [#allocation5], 0  ;;  %s4081_s0 = inlined_call_operand.vmem [shape: bf16[64,128], index: 0, kind: input, shape index: {}]   ;;  %s4082_s1 = inlined_call_operand.vmem [shape: bf16[3,128,512], index: 1, kind: input, shape index: {}]   ;;  %s4083_s2 = inlined_call_operand.hbm [shape: bf16[3,128,512], index: 2, kind: input, shape index: {}]   ;;  %s4084_s3 = inlined_call_operand.vmem [shape: f32[3,1,512], index: 3, kind: input, shape index: {}]   ;;  %s4085_s4 = inlined_call_operand.vmem [shape: f32[128,128], index: 4, kind: input, shape index: {}]   ;;  %s4086_s5 = inlined_call_operand.vmem [shape: f32[1,128], index: 5, kind: input, shape index: {}]   ;;  %s4087_s6 = inlined_call_operand.vmem [shape: f32[128,128], index: 6, kind: input, shape index: {}]   ;;  %s4088_s7 = inlined_call_operand.vmem [shape: f32[1,128], index: 7, kind: input, shape index: {}]   ;;  %s4089_s8 = inlined_call_operand.vmem [shape: f32[8,128], index: 8, kind: output, shape index: {}]  }
   0x1   :  { %15 = vsyncpa [#allocation5 + $0x1], 0  ;;  %s3087_s27 = smov 0   ;;  %s3089_s28 = smov 0  }
   0x2   :  { %s3091_s29 = smov 0   ;;  %s3093_s30 = smov 0  }
   0x3 LB: > { %s3106_s9 = sadd.s32 4294967295, %s3032_s30   ;;  %s3109_s10 = sadd.s32 1, %s3032_s30   ;;  %s3032_s30 = sphi %s3093_s30, %s4100_s30   ;;  %s3028_s29 = sphi %s3091_s29, %s4099_s29   ;;  %s3024_s28 = sphi %s3089_s28, %s4098_s28   ;;  %s3020_s27 = sphi %s3087_s27, %s4097_s27  }
   0x4   : > { %s72_s11 = ssub.s32 %s3032_s30, %s3109_s10  ;;  %s75_s12 = sadd.s32 1, %s3028_s29 }
   0x5   : > { %p73_p0 = scmp.eq.s32.totalorder %s72_s11, 0  ;;  %p82_p1 = scmp.ne.s32.totalorder %s3028_s29, %s3024_s28 }
   0x6   : > { %p83_p2 = scmp.eq.s32.totalorder %s3032_s30, 0  ;;  %p88_p3 = scmp.ne.s32.totalorder %s3024_s28, %s3020_s27 }
   0x7   : > { %s3119_s13 = scalar_select %p73_p0, %s3028_s29, %s75_s12  }
   0x8   : > { %p84_p4 = por %p83_p2, %p82_p1  ;;  %p4090_p5 = scmp.eq.s32.totalorder %s3106_s9, 0 }
   0x9   : > { %p2772_p6 = scmp.lt.s32.totalorder %s3032_s30, 3  ;;  %s266_s15 = sand.u32 1, %s3028_s29  }
   0xa   : > { %p3125_p7 = por %p4090_p5, %p88_p3  ;;  %s2541_s16 = sshll.u32 %s266_s15, 8 }
   0xb   : > { %s2660_s17 = sshll.u32 %s3032_s30, 12  ;;  %s270_s21 = scalar_lea.vmem [#allocation4], %s2541_s16 }
   0xc   : > { %s4092_s14 = scalar_select %p3125_p7, 1, 0 }
   0xd   : > { %s3134_s20 = scalar_lea.hbm %s4083_s2, %s2660_s17  ;;  %s277_s22 = sshll.u32 %s270_s21, 4  ;;  %s3136_s22 = int_to_ptr.vmem [resolvable:$true] %s277_s22 }
   0xe   : > { %p3138_p8 = pnand %p2772_p6, %p84_p4  ;;  %s3143_s24 = scalar_lea.sflag [#allocation5], %s266_s15 }
   0xf   : > { %s2970_s25 = scalar_lea.hbm %s3134_s20, 4096  ;;  %s2975_s11 = scalar_lea.hbm %s4083_s2, 12288 }
  0x10   : > { %p2971_p10 = scmp.ne.s32.totalorder %s3134_s20, %s2970_s25  ;;  %p2972_p11 = pneg %p3138_p8 }
  0x11   : > { %p2976_p0 = scmp.lt.s32.totalorder %s3134_s20, %s4083_s2  ;;  %p2977_p1 = scmp.lt.s32.totalorder %s2975_s11, %s2970_s25 }
  0x12   : > { %p2973_p12 = pnand %p2972_p11, %p2971_p10 }
  0x13   : > { %p2978_p2 = por %p2977_p1, %p2976_p0 }
  0x14   : > { %p2974_p13 = pneg %p2973_p12 }
  0x16   : > { %p2979_p3 = pnand %p2978_p2, %p2974_p13 }
  0x18   : > { %2982 = shalt.err (!%p2979_p3)
}
  0x19   : > { %s2983_s15 = scalar_lea.vmem %s3136_s22, 4096  ;;  %s3034_s17 = smov [#allocation4]  }
  0x1a   : > { %p2984_p4 = scmp.ne.s32.totalorder %s3136_s22, %s2983_s15  ;;  %s2988_s18 = sshll.u32 %s3034_s17, 4  ;;  %s2989_s18 = int_to_ptr.vmem [resolvable:$false] %s2988_s18 }
  0x1b   : > { %s2990_s19 = scalar_lea.vmem %s2989_s18, 8192  ;;  %p2991_p12 = scmp.lt.s32.totalorder %s3136_s22, %s2989_s18 }
  0x1c   : > { %p2986_p6 = pnand %p2984_p4, %p2972_p11  ;;  %p2992_p5 = scmp.lt.s32.totalorder %s2990_s19, %s2983_s15 }
  0x1e   : > { %p2987_p10 = pneg %p2986_p6  ;;  %p2993_p9 = por %p2992_p5, %p2991_p12 }
  0x20   : > { %p2994_p7 = pnand %p2993_p9, %p2987_p10 }
  0x22   : > { %2997 = shalt.err (!%p2994_p7)
}
  0x23   : > { %s3035_s21 = smov 256   ;;  %s3036_s25 = smov 16  }
  0x24   : > { %2771 = dma.hbm_to_vmem [thread:$0]  (!%p3138_p8), %s3134_s20, 4096, %s3136_s22, %s3143_s24, %s3035_s21, %s3035_s21, %s3036_s25  }
  0x25   : > { %p292_p11 = scmp.lt.s32.totalorder %s3032_s30, 4  ;;  %p4094_p13 = scmp.ge.s32.totalorder %s3032_s30, 1 }
  0x27   : > { %p293_p0 = pnand %p4094_p13, %p292_p11 }
  0x28   : > { %s298_s26 = sand.u32 (!%p293_p0), 1, %s3024_s28   ;;  %p4095_p5 = scmp.ne.s32.totalorder (!%p293_p0), %s4092_s14, 0 }
  0x29   : > { %296 = sbr.rel (%p293_p0) target bundleno = 2966 (0xb96), region = 52  ;;  %s2545_s27 = sshll.u32 (!%p293_p0), %s298_s26, 8 }
  0x2a   : > { %s299_s11 = scalar_lea.sflag (!%p293_p0), [#allocation5], %s298_s26  ;;  %s3168_s12 = scalar_lea.vmem (!%p293_p0), [#allocation4], %s2545_s27 }
  0x2e   : > { %3015 = dma.done.wait (%p4095_p5), %s299_s11, 4096  }
  0x2f   : > { %3017 = vsyncadd (%p4095_p5), %s299_s11, 4294963200  ;;  %p339_p7 = scmp.lt.s32.totalorder %s3106_s9, 2  ;;  %p2549_p8 = scmp.ne.s32.totalorder %s3106_s9, 0 }
  0x31   : > { %s340_s20 = scalar_select %p339_p7, %s3106_s9, 2 }
  0x33   : > { %s2661_s22 = sshll.u32 %s340_s20, 8  ;;  %s2548_s14 = sshll.u32 %s340_s20, 2 }
  0x34   : > { %s3179_s24 = scalar_lea.vmem %s4082_s1, %s2661_s22  ;;  %s347_s17 = scalar_lea.vmem %s4084_s3, %s2548_s14 }
  0x35   : > { %v3182_v0 = vld [vmem:[%s3179_s24] sm:$0xff]  ;;  %v3185_v1 = vld [vmem:[%s3179_s24 + $0x8] sm:$0xff]  ;;  %v3188_v2 = vld [vmem:[%s3179_s24 + $0x10] sm:$0xff] }
  0x36   : > { %v3191_v3 = vld [vmem:[%s3179_s24 + $0x18] sm:$0xff]  ;;  %v3194_v4 = vld [vmem:[%s3179_s24 + $0x20] sm:$0xff]  ;;  %v3197_v5 = vld [vmem:[%s3179_s24 + $0x28] sm:$0xff] }
  0x37   : > { %v3200_v6 = vld [vmem:[%s3179_s24 + $0x30] sm:$0xff]  ;;  %v3203_v7 = vld [vmem:[%s3179_s24 + $0x38] sm:$0xff]  ;;  %v3206_v8 = vld [vmem:[%s3179_s24 + $0x40] sm:$0xff] }
  0x38   : > { %v3209_v9 = vld [vmem:[%s3179_s24 + $0x48] sm:$0xff]  ;;  %v3212_v10 = vld [vmem:[%s3179_s24 + $0x50] sm:$0xff]  ;;  %v3215_v11 = vld [vmem:[%s3179_s24 + $0x58] sm:$0xff] }
  0x39   : > { %v3218_v12 = vld [vmem:[%s3179_s24 + $0x60] sm:$0xff]  ;;  %v3221_v13 = vld [vmem:[%s3179_s24 + $0x68] sm:$0xff]  ;;  %v3224_v14 = vld [vmem:[%s3179_s24 + $0x70] sm:$0xff] }
  0x3a   : > { %v3227_v15 = vld [vmem:[%s3179_s24 + $0x78] sm:$0xff]  ;;  %v3230_v16 = vld [vmem:[%s3179_s24 + $0x80] sm:$0xff]  ;;  %v3233_v17 = vld [vmem:[%s3179_s24 + $0x88] sm:$0xff] }
  0x3b   : > { %v3236_v18 = vld [vmem:[%s3179_s24 + $0x90] sm:$0xff]  ;;  %v3239_v19 = vld [vmem:[%s3179_s24 + $0x98] sm:$0xff]  ;;  %v3242_v20 = vld [vmem:[%s3179_s24 + $0xa0] sm:$0xff]  ;;  %385 = sbr.rel (%p2549_p8) target bundleno = 324 (0x144), region = 60 }
  0x3c   : > { %v3248_v21 = vld [vmem:[%s3179_s24 + $0xa8] sm:$0xff]  ;;  %v3251_v22 = vld [vmem:[%s3179_s24 + $0xb0] sm:$0xff]  ;;  %v3254_v23 = vld [vmem:[%s3179_s24 + $0xb8] sm:$0xff] }
  0x3d   : > { %v3257_v24 = vld [vmem:[%s3179_s24 + $0xc0] sm:$0xff]  ;;  %v3260_v25 = vld [vmem:[%s3179_s24 + $0xc8] sm:$0xff]  ;;  %v3263_v26 = vld [vmem:[%s3179_s24 + $0xd0] sm:$0xff] }
  0x3e   : > { %v3266_v27 = vld [vmem:[%s3179_s24 + $0xd8] sm:$0xff]  ;;  %v3269_v28 = vld [vmem:[%s3179_s24 + $0xe0] sm:$0xff]  ;;  %v3272_v29 = vld [vmem:[%s3179_s24 + $0xe8] sm:$0xff] }
  0x3f   : > { %v3275_v30 = vld [vmem:[%s3179_s24 + $0xf0] sm:$0xff]  ;;  %v3278_v31 = vld [vmem:[%s3179_s24 + $0xf8] sm:$0xff]  ;;  %v3280_v32 = vld [vmem:[%s347_s17] sm:$0xf] }
  0x40   : > { %v2583_v33 = vcombine.high %v3269_v28, %v3275_v30  ;;  %v2585_v34 = vcombine.high %v3272_v29, %v3278_v31  ;;  %v2582_v35 = vcombine.low %v3269_v28, %v3275_v30  ;;  %v2584_v36 = vcombine.low %v3272_v29, %v3278_v31 }
  0x41   : > { %v2579_v37 = vcombine.high %v3257_v24, %v3263_v26  ;;  %v2581_v38 = vcombine.high %v3260_v25, %v3266_v27  ;;  %v2578_v39 = vcombine.low %v3257_v24, %v3263_v26  ;;  %v2580_v40 = vcombine.low %v3260_v25, %v3266_v27 }
  0x42   : > { %599 = vmatprep.subr.bf16.mxu0 %v2583_v33  ;;  %672 = vmatprep.subr.bf16.mxu1 %v2585_v34  ;;  %v2575_v41 = vcombine.high %v3242_v20, %v3251_v22  ;;  %v2577_v42 = vcombine.high %v3248_v21, %v3254_v23  ;;  %v3037_v43 = vmov 0   ;;  %v2574_v44 = vcombine.low %v3242_v20, %v3251_v22 }
  0x43   : > { %600 = vmatpush1.bf16.msra.mxu0 %v2582_v35  ;;  %673 = vmatpush1.bf16.msra.mxu1 %v2584_v36  ;;  %v2576_v45 = vcombine.low %v3248_v21, %v3254_v23  ;;  %v2571_v46 = vcombine.high %v3230_v16, %v3236_v18  ;;  %v2573_v47 = vcombine.high %v3233_v17, %v3239_v19  ;;  %v2812_v35 = vld [vmem:[%s4081_s0] sm:$0xff]   ;;  %v2813_v36 = vld [vmem:[%s4081_s0 + $0x8] sm:$0xff]  }
  0x44   : > { %601 = vmatprep.subr.bf16.mxu0 %v2579_v37  ;;  %674 = vmatprep.subr.bf16.mxu1 %v2581_v38  ;;  %v2570_v48 = vcombine.low %v3230_v16, %v3236_v18  ;;  %v2572_v49 = vcombine.low %v3233_v17, %v3239_v19  ;;  %v2567_v50 = vcombine.high %v3218_v12, %v3224_v14  ;;  %v2814_v37 = vld [vmem:[%s4081_s0 + $0x10] sm:$0xff]   ;;  %v2815_v38 = vld [vmem:[%s4081_s0 + $0x18] sm:$0xff]  }
  0x45   : > { %631 = vmatprep.mubr.bf16.mxu0 %v3037_v43  ;;  %704 = vmatprep.mubr.bf16.mxu1 %v3037_v43  ;;  %v2569_v51 = vcombine.high %v3221_v13, %v3227_v15  ;;  %v2566_v52 = vcombine.low %v3218_v12, %v3224_v14  ;;  %v2568_v53 = vcombine.low %v3221_v13, %v3227_v15 }
  0x46   : > { %v2563_v54 = vcombine.high %v3206_v8, %v3212_v10  ;;  %v2565_v55 = vcombine.high %v3209_v9, %v3215_v11  ;;  %v2562_v56 = vcombine.low %v3206_v8, %v3212_v10  ;;  %v2564_v57 = vcombine.low %v3209_v9, %v3215_v11 }
  0x47   : > { %602 = vmatpush1.bf16.msra.mxu0 %v2578_v39  ;;  %675 = vmatpush1.bf16.msra.mxu1 %v2580_v40  ;;  %v2559_v58 = vcombine.high %v3194_v4, %v3200_v6  ;;  %v2561_v59 = vcombine.high %v3197_v5, %v3203_v7  ;;  %v2558_v60 = vcombine.low %v3194_v4, %v3200_v6  ;;  %v395_v39 = vlaneseq }
  0x48   : > { %603 = vmatprep.subr.bf16.mxu0 %v2575_v41  ;;  %676 = vmatprep.subr.bf16.mxu1 %v2577_v42  ;;  %v2560_v61 = vcombine.low %v3197_v5, %v3203_v7  ;;  %v2555_v62 = vcombine.high %v3182_v0, %v3188_v2  ;;  %v2557_v63 = vcombine.high %v3185_v1, %v3191_v3 }
  0x49   : > { %v2554_v33 = vcombine.low %v3182_v0, %v3188_v2  ;;  %v2556_v34 = vcombine.low %v3185_v1, %v3191_v3  ;;  %v396_v40 = vshrl.u32 %v395_v39, 7 }
  0x4b   : > { %604 = vmatpush1.bf16.msra.mxu0 %v2574_v44  ;;  %677 = vmatpush1.bf16.msra.mxu1 %v2576_v45  ;;  %v397_v41 = vsub.s32 0, %v396_v40  ;;  %v405_v42 = vsub.s32 2, %v396_v40  ;;  %v401_v44 = vsub.s32 1, %v396_v40  ;;  %v409_v45 = vsub.s32 3, %v396_v40 }
  0x4c   : > { %605 = vmatprep.subr.bf16.mxu0 %v2571_v46  ;;  %678 = vmatprep.subr.bf16.mxu1 %v2573_v47 }
  0x4d   : > { %v3368_v46 = vrot.slane %v3280_v32, %v397_v41  ;;  %v3371_v47 = vrot.slane %v3280_v32, %v405_v42 }
  0x4f   : > { %606 = vmatpush1.bf16.msra.mxu0 %v2570_v48  ;;  %679 = vmatpush1.bf16.msra.mxu1 %v2572_v49  ;;  %v3377_v48 = vrot.slane %v3280_v32, %v409_v45 }
  0x50   : > { %607 = vmatprep.subr.bf16.mxu0 %v2567_v50  ;;  %680 = vmatprep.subr.bf16.mxu1 %v2569_v51 }
  0x53   : > { %608 = vmatpush1.bf16.msra.mxu0 %v2566_v52  ;;  %681 = vmatpush1.bf16.msra.mxu1 %v2568_v53 }
  0x54   : > { %609 = vmatprep.subr.bf16.mxu0 %v2563_v54  ;;  %682 = vmatprep.subr.bf16.mxu1 %v2565_v55 }
  0x57   : > { %610 = vmatpush1.bf16.msra.mxu0 %v2562_v56  ;;  %683 = vmatpush1.bf16.msra.mxu1 %v2564_v57 }
  0x58   : > { %611 = vmatprep.subr.bf16.mxu0 %v2559_v58  ;;  %684 = vmatprep.subr.bf16.mxu1 %v2561_v59 }
  0x5b   : > { %612 = vmatpush1.bf16.msra.mxu0 %v2558_v60  ;;  %685 = vmatpush1.bf16.msra.mxu1 %v2560_v61 }
  0x5c   : > { %613 = vmatprep.subr.bf16.mxu0 %v2555_v62  ;;  %686 = vmatprep.subr.bf16.mxu1 %v2557_v63 }
  0x5f   : > { %614 = vmatpush1.bf16.msra.mxu0 %v2554_v33  ;;  %687 = vmatpush1.bf16.msra.mxu1 %v2556_v34 }
  0x62   : > { %632 = vmatmul.mubr.bf16.vlgmr.msra.gmra.mxu0 %v2812_v35  ;;  %705 = vmatmul.mubr.bf16.vlgmr.msra.gmra.mxu1 %v2812_v35 }
  0x63   : > { %641 = vmatprep.mubr.bf16.mxu0 %v3037_v43  ;;  %714 = vmatprep.mubr.bf16.mxu1 %v3037_v43 }
  0x6a   : > { %642 = vmatmul.mubr.bf16.gmra.mxu0 %v2813_v36  ;;  %715 = vmatmul.mubr.bf16.gmra.mxu1 %v2813_v36 }
  0x6b   : > { %651 = vmatprep.mubr.bf16.mxu0 %v3037_v43  ;;  %724 = vmatprep.mubr.bf16.mxu1 %v3037_v43 }
  0x72   : > { %652 = vmatmul.mubr.bf16.gmra.mxu0 %v2814_v37  ;;  %725 = vmatmul.mubr.bf16.gmra.mxu1 %v2814_v37 }
  0x73   : > { %661 = vmatprep.mubr.bf16.mxu0 %v3037_v43  ;;  %734 = vmatprep.mubr.bf16.mxu1 %v3037_v43  ;;  %v3374_v43 = vrot.slane %v3280_v32, %v401_v44 }
  0x7a   : > { %662 = vmatmul.mubr.bf16.gmra.mxu0 %v2815_v38  ;;  %735 = vmatmul.mubr.bf16.gmra.mxu1 %v2815_v38 }
 0x122   : > { %v633_v49 = vpop.f32.mrf.mxu0  ;;  %v706_v50 = vpop.f32.mrf.mxu1 }
 0x123   : > { %v634_v51 = vadd.f32 %v633_v49, %v3368_v46  ;;  %v707_v52 = vadd.f32 %v706_v50, %v3371_v47 }
 0x124   : > { %v635_v53 = vpop.f32.mrf.mxu0  ;;  %v708_v54 = vpop.f32.mrf.mxu1 }
 0x125   : > { %745 = vst [vmem:[#allocation2 + $0xb0] sm:$0xff] %v634_v51  ;;  %747 = vst [vmem:[#allocation2 + $0xd8] sm:$0xff] %v707_v52  ;;  %v636_v55 = vadd.f32 %v635_v53, %v3374_v43  ;;  %v709_v56 = vadd.f32 %v708_v54, %v3377_v48 }
 0x126   : > { %v637_v57 = vpop.f32.mrf.mxu0  ;;  %v710_v58 = vpop.f32.mrf.mxu1 }
 0x127   : > { %746 = vst [vmem:[#allocation2] sm:$0xff] %v636_v55  ;;  %748 = vst [vmem:[#allocation2 + $0x18] sm:$0xff] %v709_v56  ;;  %v638_v59 = vadd.f32 %v637_v57, %v3368_v46  ;;  %v711_v60 = vadd.f32 %v710_v58, %v3371_v47 }
 0x128   : > { %v639_v61 = vpop.f32.mrf.mxu0  ;;  %v712_v62 = vpop.f32.mrf.mxu1 }
 0x129   : > { %749 = vst [vmem:[#allocation2 + $0x50] sm:$0xff] %v638_v59  ;;  %751 = vst [vmem:[#allocation2 + $0x30] sm:$0xff] %v711_v60  ;;  %v640_v63 = vadd.f32 %v639_v61, %v3374_v43  ;;  %v713_v33 = vadd.f32 %v712_v62, %v3377_v48 }
 0x12a   : > { %v643_v34 = vpop.f32.mrf.mxu0  ;;  %v716_v35 = vpop.f32.mrf.mxu1 }
 0x12b   : > { %750 = vst [vmem:[#allocation2 + $0x68] sm:$0xff] %v640_v63  ;;  %752 = vst [vmem:[#allocation2 + $0x48] sm:$0xff] %v713_v33  ;;  %v644_v36 = vadd.f32 %v643_v34, %v3368_v46  ;;  %v717_v37 = vadd.f32 %v716_v35, %v3371_v47 }
 0x12c   : > { %v645_v38 = vpop.f32.mrf.mxu0  ;;  %v718_v39 = vpop.f32.mrf.mxu1 }
 0x12d   : > { %753 = vst [vmem:[#allocation2 + $0x80] sm:$0xff] %v644_v36  ;;  %755 = vst [vmem:[#allocation2 + $0xe8] sm:$0xff] %v717_v37  ;;  %v646_v40 = vadd.f32 %v645_v38, %v3374_v43  ;;  %v719_v41 = vadd.f32 %v718_v39, %v3377_v48 }
 0x12e   : > { %v647_v42 = vpop.f32.mrf.mxu0  ;;  %v720_v44 = vpop.f32.mrf.mxu1 }
 0x12f   : > { %754 = vst [vmem:[#allocation2 + $0x88] sm:$0xff] %v646_v40  ;;  %756 = vst [vmem:[#allocation2 + $0xb8] sm:$0xff] %v719_v41  ;;  %v648_v45 = vadd.f32 %v647_v42, %v3368_v46  ;;  %v721_v49 = vadd.f32 %v720_v44, %v3371_v47 }
 0x130   : > { %v649_v50 = vpop.f32.mrf.mxu0  ;;  %v722_v51 = vpop.f32.mrf.mxu1 }
 0x131   : > { %757 = vst [vmem:[#allocation2 + $0x60] sm:$0xff] %v648_v45  ;;  %759 = vst [vmem:[#allocation2 + $0x8] sm:$0xff] %v721_v49  ;;  %v650_v52 = vadd.f32 %v649_v50, %v3374_v43  ;;  %v723_v53 = vadd.f32 %v722_v51, %v3377_v48 }
 0x132   : > { %v653_v54 = vpop.f32.mrf.mxu0  ;;  %v726_v55 = vpop.f32.mrf.mxu1 }
 0x133   : > { %758 = vst [vmem:[#allocation2 + $0xf0] sm:$0xff] %v650_v52  ;;  %760 = vst [vmem:[#allocation2 + $0x78] sm:$0xff] %v723_v53  ;;  %v654_v56 = vadd.f32 %v653_v54, %v3368_v46  ;;  %v727_v57 = vadd.f32 %v726_v55, %v3371_v47 }
 0x134   : > { %v655_v58 = vpop.f32.mrf.mxu0  ;;  %v728_v59 = vpop.f32.mrf.mxu1 }
 0x135   : > { %761 = vst [vmem:[#allocation2 + $0x38] sm:$0xff] %v654_v56  ;;  %763 = vst [vmem:[#allocation2 + $0x40] sm:$0xff] %v727_v57  ;;  %v656_v60 = vadd.f32 %v655_v58, %v3374_v43  ;;  %v729_v61 = vadd.f32 %v728_v59, %v3377_v48 }
 0x136   : > { %v657_v62 = vpop.f32.mrf.mxu0  ;;  %v730_v63 = vpop.f32.mrf.mxu1 }
 0x137   : > { %762 = vst [vmem:[#allocation2 + $0x58] sm:$0xff] %v656_v60  ;;  %764 = vst [vmem:[#allocation2 + $0xc8] sm:$0xff] %v729_v61  ;;  %v658_v33 = vadd.f32 %v657_v62, %v3368_v46  ;;  %v731_v34 = vadd.f32 %v730_v63, %v3371_v47 }
 0x138   : > { %v659_v35 = vpop.f32.mrf.mxu0  ;;  %v732_v36 = vpop.f32.mrf.mxu1 }
 0x139   : > { %765 = vst [vmem:[#allocation2 + $0xe0] sm:$0xff] %v658_v33  ;;  %767 = vst [vmem:[#allocation2 + $0x70] sm:$0xff] %v731_v34  ;;  %v660_v37 = vadd.f32 %v659_v35, %v3374_v43  ;;  %v733_v38 = vadd.f32 %v732_v36, %v3377_v48 }
 0x13a   : > { %v663_v39 = vpop.f32.mrf.mxu0  ;;  %v736_v40 = vpop.f32.mrf.mxu1 }
 0x13b   : > { %766 = vst [vmem:[#allocation2 + $0x90] sm:$0xff] %v660_v37  ;;  %768 = vst [vmem:[#allocation2 + $0xc0] sm:$0xff] %v733_v38  ;;  %v664_v41 = vadd.f32 %v663_v39, %v3368_v46  ;;  %v737_v42 = vadd.f32 %v736_v40, %v3371_v47 }
 0x13c   : > { %v665_v44 = vpop.f32.mrf.mxu0  ;;  %v738_v45 = vpop.f32.mrf.mxu1 }
 0x13d   : > { %769 = vst [vmem:[#allocation2 + $0xa8] sm:$0xff] %v664_v41  ;;  %771 = vst [vmem:[#allocation2 + $0x10] sm:$0xff] %v737_v42  ;;  %v666_v49 = vadd.f32 %v665_v44, %v3374_v43  ;;  %v739_v50 = vadd.f32 %v738_v45, %v3377_v48 }
 0x13e   : > { %v667_v51 = vpop.f32.mrf.mxu0  ;;  %v740_v52 = vpop.f32.mrf.mxu1 }
 0x13f   : > { %770 = vst [vmem:[#allocation2 + $0xd0] sm:$0xff] %v666_v49  ;;  %772 = vst [vmem:[#allocation2 + $0x28] sm:$0xff] %v739_v50  ;;  %v668_v53 = vadd.f32 %v667_v51, %v3368_v46  ;;  %v741_v54 = vadd.f32 %v740_v52, %v3371_v47 }
 0x140   : > { %v669_v55 = vpop.f32.mrf.mxu0  ;;  %v742_v56 = vpop.f32.mrf.mxu1 }
 0x141   : > { %773 = vst [vmem:[#allocation2 + $0xa0] sm:$0xff] %v668_v53  ;;  %775 = vst [vmem:[#allocation2 + $0x20] sm:$0xff] %v741_v54  ;;  %v670_v57 = vadd.f32 %v669_v55, %v3374_v43  ;;  %v743_v58 = vadd.f32 %v742_v56, %v3377_v48 }
 0x143   : > { %774 = vst [vmem:[#allocation2 + $0xf8] sm:$0xff] %v670_v57  ;;  %776 = vst [vmem:[#allocation2 + $0x98] sm:$0xff] %v743_v58 }
 0x144 PF: > { %p4096_p9 = scmp.eq.s32.totalorder %s3106_s9, 0 }
 0x146   : > { %780 = sbr.rel (%p4096_p9) target bundleno = 591 (0x24f), region = 64 }
 0x14b   : > { %v2620_v59 = vcombine.high %v3269_v28, %v3275_v30  ;;  %v2622_v46 = vcombine.high %v3272_v29, %v3278_v31  ;;  %v2619_v47 = vcombine.low %v3269_v28, %v3275_v30  ;;  %v2621_v43 = vcombine.low %v3272_v29, %v3278_v31 }
 0x14c   : > { %v2616_v48 = vcombine.high %v3257_v24, %v3263_v26  ;;  %v2618_v60 = vcombine.high %v3260_v25, %v3266_v27  ;;  %v2615_v61 = vcombine.low %v3257_v24, %v3263_v26  ;;  %v2617_v62 = vcombine.low %v3260_v25, %v3266_v27 }
 0x14d   : > { %994 = vmatprep.subr.bf16.mxu0 %v2620_v59  ;;  %1067 = vmatprep.subr.bf16.mxu1 %v2622_v46  ;;  %v2612_v28 = vcombine.high %v3242_v20, %v3251_v22  ;;  %v2614_v29 = vcombine.high %v3248_v21, %v3254_v23  ;;  %v3038_v30 = vmov 0   ;;  %v2611_v24 = vcombine.low %v3242_v20, %v3251_v22 }
 0x14e   : > { %995 = vmatpush1.bf16.msra.mxu0 %v2619_v47  ;;  %1068 = vmatpush1.bf16.msra.mxu1 %v2621_v43  ;;  %v2613_v25 = vcombine.low %v3248_v21, %v3254_v23  ;;  %v2608_v26 = vcombine.high %v3230_v16, %v3236_v18  ;;  %v2610_v27 = vcombine.high %v3233_v17, %v3239_v19 }
 0x14f   : > { %996 = vmatprep.subr.bf16.mxu0 %v2616_v48  ;;  %1069 = vmatprep.subr.bf16.mxu1 %v2618_v60  ;;  %v2607_v31 = vcombine.low %v3230_v16, %v3236_v18  ;;  %v2609_v63 = vcombine.low %v3233_v17, %v3239_v19  ;;  %v2604_v20 = vcombine.high %v3218_v12, %v3224_v14 }
 0x150   : > { %1026 = vmatprep.mubr.bf16.mxu0 %v3038_v30  ;;  %1099 = vmatprep.mubr.bf16.mxu1 %v3038_v30  ;;  %v2606_v21 = vcombine.high %v3221_v13, %v3227_v15  ;;  %v2603_v22 = vcombine.low %v3218_v12, %v3224_v14  ;;  %v2605_v23 = vcombine.low %v3221_v13, %v3227_v15 }
 0x151   : > { %v2600_v16 = vcombine.high %v3206_v8, %v3212_v10  ;;  %v2602_v17 = vcombine.high %v3209_v9, %v3215_v11  ;;  %v2599_v18 = vcombine.low %v3206_v8, %v3212_v10  ;;  %v2601_v19 = vcombine.low %v3209_v9, %v3215_v11 }
 0x152   : > { %997 = vmatpush1.bf16.msra.mxu0 %v2615_v61  ;;  %1070 = vmatpush1.bf16.msra.mxu1 %v2617_v62  ;;  %v2596_v12 = vcombine.high %v3194_v4, %v3200_v6  ;;  %v2598_v13 = vcombine.high %v3197_v5, %v3203_v7  ;;  %v2595_v14 = vcombine.low %v3194_v4, %v3200_v6  ;;  %v2816_v4 = vld [vmem:[#allocation3] sm:$0xff]  }
 0x153   : > { %998 = vmatprep.subr.bf16.mxu0 %v2612_v28  ;;  %1071 = vmatprep.subr.bf16.mxu1 %v2614_v29  ;;  %v2597_v15 = vcombine.low %v3197_v5, %v3203_v7  ;;  %v2592_v8 = vcombine.high %v3182_v0, %v3188_v2  ;;  %v2594_v9 = vcombine.high %v3185_v1, %v3191_v3  ;;  %v2817_v5 = vld [vmem:[#allocation3 + $0x8] sm:$0xff]  }
 0x154   : > { %v2591_v10 = vcombine.low %v3182_v0, %v3188_v2  ;;  %v2593_v11 = vcombine.low %v3185_v1, %v3191_v3  ;;  %v2818_v0 = vld [vmem:[#allocation3 + $0x10] sm:$0xff]   ;;  %v2819_v1 = vld [vmem:[#allocation3 + $0x18] sm:$0xff]   ;;  %v790_v2 = vlaneseq }
 0x156   : > { %999 = vmatpush1.bf16.msra.mxu0 %v2611_v24  ;;  %1072 = vmatpush1.bf16.msra.mxu1 %v2613_v25  ;;  %v791_v3 = vshrl.u32 %v790_v2, 7 }
 0x157   : > { %1000 = vmatprep.subr.bf16.mxu0 %v2608_v26  ;;  %1073 = vmatprep.subr.bf16.mxu1 %v2610_v27 }
 0x158   : > { %v792_v6 = vsub.s32 0, %v791_v3  ;;  %v800_v7 = vsub.s32 2, %v791_v3  ;;  %v796_v33 = vsub.s32 1, %v791_v3  ;;  %v804_v34 = vsub.s32 3, %v791_v3 }
 0x15a   : > { %1001 = vmatpush1.bf16.msra.mxu0 %v2607_v31  ;;  %1074 = vmatpush1.bf16.msra.mxu1 %v2609_v63  ;;  %v3486_v35 = vrot.slane %v3280_v32, %v792_v6  ;;  %v3489_v36 = vrot.slane %v3280_v32, %v800_v7  ;;  %v3492_v37 = vrot.slane %v3280_v32, %v796_v33 }
 0x15b   : > { %1002 = vmatprep.subr.bf16.mxu0 %v2604_v20  ;;  %1075 = vmatprep.subr.bf16.mxu1 %v2606_v21  ;;  %v3495_v38 = vrot.slane %v3280_v32, %v804_v34 }
 0x15e   : > { %1003 = vmatpush1.bf16.msra.mxu0 %v2603_v22  ;;  %1076 = vmatpush1.bf16.msra.mxu1 %v2605_v23 }
 0x15f   : > { %1004 = vmatprep.subr.bf16.mxu0 %v2600_v16  ;;  %1077 = vmatprep.subr.bf16.mxu1 %v2602_v17 }
 0x162   : > { %1005 = vmatpush1.bf16.msra.mxu0 %v2599_v18  ;;  %1078 = vmatpush1.bf16.msra.mxu1 %v2601_v19 }
 0x163   : > { %1006 = vmatprep.subr.bf16.mxu0 %v2596_v12  ;;  %1079 = vmatprep.subr.bf16.mxu1 %v2598_v13 }
 0x166   : > { %1007 = vmatpush1.bf16.msra.mxu0 %v2595_v14  ;;  %1080 = vmatpush1.bf16.msra.mxu1 %v2597_v15 }
 0x167   : > { %1008 = vmatprep.subr.bf16.mxu0 %v2592_v8  ;;  %1081 = vmatprep.subr.bf16.mxu1 %v2594_v9 }
 0x16a   : > { %1009 = vmatpush1.bf16.msra.mxu0 %v2591_v10  ;;  %1082 = vmatpush1.bf16.msra.mxu1 %v2593_v11 }
 0x16d   : > { %1027 = vmatmul.mubr.bf16.vlgmr.msra.gmra.mxu0 %v2816_v4  ;;  %1100 = vmatmul.mubr.bf16.vlgmr.msra.gmra.mxu1 %v2816_v4 }
 0x16e   : > { %1036 = vmatprep.mubr.bf16.mxu0 %v3038_v30  ;;  %1109 = vmatprep.mubr.bf16.mxu1 %v3038_v30 }
 0x175   : > { %1037 = vmatmul.mubr.bf16.gmra.mxu0 %v2817_v5  ;;  %1110 = vmatmul.mubr.bf16.gmra.mxu1 %v2817_v5 }
 0x176   : > { %1046 = vmatprep.mubr.bf16.mxu0 %v3038_v30  ;;  %1119 = vmatprep.mubr.bf16.mxu1 %v3038_v30 }
 0x17d   : > { %1047 = vmatmul.mubr.bf16.gmra.mxu0 %v2818_v0  ;;  %1120 = vmatmul.mubr.bf16.gmra.mxu1 %v2818_v0 }
 0x17e   : > { %1056 = vmatprep.mubr.bf16.mxu0 %v3038_v30  ;;  %1129 = vmatprep.mubr.bf16.mxu1 %v3038_v30 }
 0x185   : > { %1057 = vmatmul.mubr.bf16.gmra.mxu0 %v2819_v1  ;;  %1130 = vmatmul.mubr.bf16.gmra.mxu1 %v2819_v1 }
 0x22d   : > { %v1028_v39 = vpop.f32.mrf.mxu0  ;;  %v1101_v40 = vpop.f32.mrf.mxu1 }
 0x22e   : > { %v1029_v41 = vadd.f32 %v1028_v39, %v3486_v35  ;;  %v1102_v42 = vadd.f32 %v1101_v40, %v3489_v36 }
 0x22f   : > { %v1030_v44 = vpop.f32.mrf.mxu0  ;;  %v1103_v45 = vpop.f32.mrf.mxu1 }
 0x230   : > { %1140 = vst [vmem:[#allocation2 + $0xb0] sm:$0xff] %v1029_v41  ;;  %1142 = vst [vmem:[#allocation2 + $0xd8] sm:$0xff] %v1102_v42  ;;  %v1031_v49 = vadd.f32 %v1030_v44, %v3492_v37  ;;  %v1104_v50 = vadd.f32 %v1103_v45, %v3495_v38 }
 0x231   : > { %v1032_v51 = vpop.f32.mrf.mxu0  ;;  %v1105_v52 = vpop.f32.mrf.mxu1 }
 0x232   : > { %1141 = vst [vmem:[#allocation2] sm:$0xff] %v1031_v49  ;;  %1143 = vst [vmem:[#allocation2 + $0x18] sm:$0xff] %v1104_v50  ;;  %v1033_v32 = vadd.f32 %v1032_v51, %v3486_v35  ;;  %v1106_v53 = vadd.f32 %v1105_v52, %v3489_v36 }
 0x233   : > { %v1034_v54 = vpop.f32.mrf.mxu0  ;;  %v1107_v55 = vpop.f32.mrf.mxu1 }
 0x234   : > { %1144 = vst [vmem:[#allocation2 + $0x50] sm:$0xff] %v1033_v32  ;;  %1146 = vst [vmem:[#allocation2 + $0x30] sm:$0xff] %v1106_v53  ;;  %v1035_v56 = vadd.f32 %v1034_v54, %v3492_v37  ;;  %v1108_v57 = vadd.f32 %v1107_v55, %v3495_v38 }
 0x235   : > { %v1038_v58 = vpop.f32.mrf.mxu0  ;;  %v1111_v59 = vpop.f32.mrf.mxu1 }
 0x236   : > { %1145 = vst [vmem:[#allocation2 + $0x68] sm:$0xff] %v1035_v56  ;;  %1147 = vst [vmem:[#allocation2 + $0x48] sm:$0xff] %v1108_v57  ;;  %v1039_v46 = vadd.f32 %v1038_v58, %v3486_v35  ;;  %v1112_v47 = vadd.f32 %v1111_v59, %v3489_v36 }
 0x237   : > { %v1040_v43 = vpop.f32.mrf.mxu0  ;;  %v1113_v48 = vpop.f32.mrf.mxu1 }
 0x238   : > { %1148 = vst [vmem:[#allocation2 + $0x80] sm:$0xff] %v1039_v46  ;;  %1150 = vst [vmem:[#allocation2 + $0xe8] sm:$0xff] %v1112_v47  ;;  %v1041_v60 = vadd.f32 %v1040_v43, %v3492_v37  ;;  %v1114_v61 = vadd.f32 %v1113_v48, %v3495_v38 }
 0x239   : > { %v1042_v62 = vpop.f32.mrf.mxu0  ;;  %v1115_v28 = vpop.f32.mrf.mxu1 }
 0x23a   : > { %1149 = vst [vmem:[#allocation2 + $0x88] sm:$0xff] %v1041_v60  ;;  %1151 = vst [vmem:[#allocation2 + $0xb8] sm:$0xff] %v1114_v61  ;;  %v1043_v29 = vadd.f32 %v1042_v62, %v3486_v35  ;;  %v1116_v30 = vadd.f32 %v1115_v28, %v3489_v36 }
 0x23b   : > { %v1044_v24 = vpop.f32.mrf.mxu0  ;;  %v1117_v25 = vpop.f32.mrf.mxu1 }
 0x23c   : > { %1152 = vst [vmem:[#allocation2 + $0x60] sm:$0xff] %v1043_v29  ;;  %1154 = vst [vmem:[#allocation2 + $0x8] sm:$0xff] %v1116_v30  ;;  %v1045_v26 = vadd.f32 %v1044_v24, %v3492_v37  ;;  %v1118_v27 = vadd.f32 %v1117_v25, %v3495_v38 }
 0x23d   : > { %v1048_v31 = vpop.f32.mrf.mxu0  ;;  %v1121_v63 = vpop.f32.mrf.mxu1 }
 0x23e   : > { %1153 = vst [vmem:[#allocation2 + $0xf0] sm:$0xff] %v1045_v26  ;;  %1155 = vst [vmem:[#allocation2 + $0x78] sm:$0xff] %v1118_v27  ;;  %v1049_v20 = vadd.f32 %v1048_v31, %v3486_v35  ;;  %v1122_v21 = vadd.f32 %v1121_v63, %v3489_v36 }
 0x23f   : > { %v1050_v22 = vpop.f32.mrf.mxu0  ;;  %v1123_v23 = vpop.f32.mrf.mxu1 }
 0x240   : > { %1156 = vst [vmem:[#allocation2 + $0x38] sm:$0xff] %v1049_v20  ;;  %1158 = vst [vmem:[#allocation2 + $0x40] sm:$0xff] %v1122_v21  ;;  %v1051_v16 = vadd.f32 %v1050_v22, %v3492_v37  ;;  %v1124_v17 = vadd.f32 %v1123_v23, %v3495_v38 }
 0x241   : > { %v1052_v18 = vpop.f32.mrf.mxu0  ;;  %v1125_v19 = vpop.f32.mrf.mxu1 }
 0x242   : > { %1157 = vst [vmem:[#allocation2 + $0x58] sm:$0xff] %v1051_v16  ;;  %1159 = vst [vmem:[#allocation2 + $0xc8] sm:$0xff] %v1124_v17  ;;  %v1053_v12 = vadd.f32 %v1052_v18, %v3486_v35  ;;  %v1126_v13 = vadd.f32 %v1125_v19, %v3489_v36 }
 0x243   : > { %v1054_v14 = vpop.f32.mrf.mxu0  ;;  %v1127_v15 = vpop.f32.mrf.mxu1 }
 0x244   : > { %1160 = vst [vmem:[#allocation2 + $0xe0] sm:$0xff] %v1053_v12  ;;  %1162 = vst [vmem:[#allocation2 + $0x70] sm:$0xff] %v1126_v13  ;;  %v1055_v8 = vadd.f32 %v1054_v14, %v3492_v37  ;;  %v1128_v9 = vadd.f32 %v1127_v15, %v3495_v38 }
 0x245   : > { %v1058_v10 = vpop.f32.mrf.mxu0  ;;  %v1131_v11 = vpop.f32.mrf.mxu1 }
 0x246   : > { %1161 = vst [vmem:[#allocation2 + $0x90] sm:$0xff] %v1055_v8  ;;  %1163 = vst [vmem:[#allocation2 + $0xc0] sm:$0xff] %v1128_v9  ;;  %v1059_v4 = vadd.f32 %v1058_v10, %v3486_v35  ;;  %v1132_v5 = vadd.f32 %v1131_v11, %v3489_v36 }
 0x247   : > { %v1060_v0 = vpop.f32.mrf.mxu0  ;;  %v1133_v1 = vpop.f32.mrf.mxu1 }
 0x248   : > { %1164 = vst [vmem:[#allocation2 + $0xa8] sm:$0xff] %v1059_v4  ;;  %1166 = vst [vmem:[#allocation2 + $0x10] sm:$0xff] %v1132_v5  ;;  %v1061_v2 = vadd.f32 %v1060_v0, %v3492_v37  ;;  %v1134_v3 = vadd.f32 %v1133_v1, %v3495_v38 }
 0x249   : > { %v1062_v6 = vpop.f32.mrf.mxu0  ;;  %v1135_v7 = vpop.f32.mrf.mxu1 }
 0x24a   : > { %1165 = vst [vmem:[#allocation2 + $0xd0] sm:$0xff] %v1061_v2  ;;  %1167 = vst [vmem:[#allocation2 + $0x28] sm:$0xff] %v1134_v3  ;;  %v1063_v33 = vadd.f32 %v1062_v6, %v3486_v35  ;;  %v1136_v34 = vadd.f32 %v1135_v7, %v3489_v36 }
 0x24b   : > { %v1064_v39 = vpop.f32.mrf.mxu0  ;;  %v1137_v40 = vpop.f32.mrf.mxu1 }
 0x24c   : > { %1168 = vst [vmem:[#allocation2 + $0xa0] sm:$0xff] %v1063_v33  ;;  %1170 = vst [vmem:[#allocation2 + $0x20] sm:$0xff] %v1136_v34  ;;  %v1065_v41 = vadd.f32 %v1064_v39, %v3492_v37  ;;  %v1138_v42 = vadd.f32 %v1137_v40, %v3495_v38 }
 0x24e   : > { %1169 = vst [vmem:[#allocation2 + $0xf8] sm:$0xff] %v1065_v41  ;;  %1171 = vst [vmem:[#allocation2 + $0x98] sm:$0xff] %v1138_v42 }
 0x24f PF: > { %v3530_v35 = vld [vmem:[%s3168_s12 + $0xe4] ss:$16 sps:$4 sm:$0xff]   ;;  %v3533_v36 = vld [vmem:[%s3168_s12 + $0xec] ss:$16 sps:$4 sm:$0xff]   ;;  %v3039_v44 = vmov 0   ;;  %p2655_p1 = scmp.ne.s32.totalorder %s3106_s9, 2 }
 0x250   : > { %1403 = vmatprep.mubr.bf16.mxu0 %v3039_v44  ;;  %1444 = vmatprep.mubr.bf16.mxu1 %v3039_v44  ;;  %v3539_v37 = vld [vmem:[%s3168_s12 + $0xe0] ss:$16 sps:$4 sm:$0xff]   ;;  %v3542_v38 = vld [vmem:[%s3168_s12 + $0xe8] ss:$16 sps:$4 sm:$0xff]   ;;  %v3546_v45 = vld [vmem:[%s3168_s12 + $0xc4] ss:$16 sps:$4 sm:$0xff]  }
 0x251   : > { %1371 = vmatprep.subr.bf16.mxu0 %v3530_v35  ;;  %1412 = vmatprep.subr.bf16.mxu1 %v3533_v36  ;;  %v3551_v49 = vld [vmem:[%s3168_s12 + $0xcc] ss:$16 sps:$4 sm:$0xff]   ;;  %v3554_v50 = vld [vmem:[%s3168_s12 + $0xc0] ss:$16 sps:$4 sm:$0xff]   ;;  %v3558_v51 = vld [vmem:[%s3168_s12 + $0xc8] ss:$16 sps:$4 sm:$0xff]  }
 0x252   : > { %1372 = vmatpush1.bf16.msra.mxu0 %v3539_v37  ;;  %1413 = vmatpush1.bf16.msra.mxu1 %v3542_v38  ;;  %v3562_v52 = vld [vmem:[%s3168_s12 + $0xa4] ss:$16 sps:$4 sm:$0xff]   ;;  %v3565_v32 = vld [vmem:[%s3168_s12 + $0xac] ss:$16 sps:$4 sm:$0xff]   ;;  %v3568_v53 = vld [vmem:[%s3168_s12 + $0xa0] ss:$16 sps:$4 sm:$0xff]  }
 0x253   : > { %1373 = vmatprep.subr.bf16.mxu0 %v3546_v45  ;;  %1414 = vmatprep.subr.bf16.mxu1 %v3551_v49  ;;  %v3571_v54 = vld [vmem:[%s3168_s12 + $0xa8] ss:$16 sps:$4 sm:$0xff]   ;;  %v3576_v55 = vld [vmem:[%s3168_s12 + $0x84] ss:$16 sps:$4 sm:$0xff]   ;;  %v3581_v56 = vld [vmem:[%s3168_s12 + $0x8c] ss:$16 sps:$4 sm:$0xff]  }
 0x254   : > { %v3584_v57 = vld [vmem:[%s3168_s12 + $0x80] ss:$16 sps:$4 sm:$0xff]   ;;  %v3589_v58 = vld [vmem:[%s3168_s12 + $0x88] ss:$16 sps:$4 sm:$0xff]   ;;  %v3592_v59 = vld [vmem:[%s3168_s12 + $0x64] ss:$16 sps:$4 sm:$0xff]  }
 0x255   : > { %v3597_v46 = vld [vmem:[%s3168_s12 + $0x6c] ss:$16 sps:$4 sm:$0xff]   ;;  %v3600_v47 = vld [vmem:[%s3168_s12 + $0x60] ss:$16 sps:$4 sm:$0xff]   ;;  %v3603_v43 = vld [vmem:[%s3168_s12 + $0x68] ss:$16 sps:$4 sm:$0xff]  }
 0x256   : > { %1374 = vmatpush1.bf16.msra.mxu0 %v3554_v50  ;;  %1415 = vmatpush1.bf16.msra.mxu1 %v3558_v51  ;;  %v3608_v48 = vld [vmem:[%s3168_s12 + $0x44] ss:$16 sps:$4 sm:$0xff]   ;;  %v3613_v60 = vld [vmem:[%s3168_s12 + $0x4c] ss:$16 sps:$4 sm:$0xff]   ;;  %v3618_v61 = vld [vmem:[%s3168_s12 + $0x40] ss:$16 sps:$4 sm:$0xff]  }
 0x257   : > { %1375 = vmatprep.subr.bf16.mxu0 %v3562_v52  ;;  %1416 = vmatprep.subr.bf16.mxu1 %v3565_v32  ;;  %v3621_v62 = vld [vmem:[%s3168_s12 + $0x48] ss:$16 sps:$4 sm:$0xff]   ;;  %v3626_v28 = vld [vmem:[%s3168_s12 + $0x24] ss:$16 sps:$4 sm:$0xff]   ;;  %v3629_v29 = vld [vmem:[%s3168_s12 + $0x2c] ss:$16 sps:$4 sm:$0xff]  }
 0x258   : > { %v3634_v30 = vld [vmem:[%s3168_s12 + $0x20] ss:$16 sps:$4 sm:$0xff]   ;;  %v3637_v24 = vld [vmem:[%s3168_s12 + $0x28] ss:$16 sps:$4 sm:$0xff]   ;;  %v3642_v25 = vld [vmem:[%s3168_s12 + $0x4] ss:$16 sps:$4 sm:$0xff]  }
 0x259   : > { %v3645_v26 = vld [vmem:[%s3168_s12 + $0xc] ss:$16 sps:$4 sm:$0xff]   ;;  %v3650_v27 = vld [vmem:[%s3168_s12] ss:$16 sps:$4 sm:$0xff]   ;;  %v3653_v31 = vld [vmem:[%s3168_s12 + $0x8] ss:$16 sps:$4 sm:$0xff]  }
 0x25a   : > { %1376 = vmatpush1.bf16.msra.mxu0 %v3568_v53  ;;  %1417 = vmatpush1.bf16.msra.mxu1 %v3571_v54  ;;  %v1207_v63 = vld [vmem:[#allocation2 + $0xb0] sm:$0xff]  ;;  %v1208_v22 = vld [vmem:[#allocation2] sm:$0xff]  ;;  %v1210_v17 = vld [vmem:[#allocation2 + $0x18] sm:$0xff] }
 0x25b   : > { %1377 = vmatprep.subr.bf16.mxu0 %v3576_v55  ;;  %1418 = vmatprep.subr.bf16.mxu1 %v3581_v56  ;;  %v1209_v11 = vld [vmem:[#allocation2 + $0xd8] sm:$0xff] }
 0x25e   : > { %1378 = vmatpush1.bf16.msra.mxu0 %v3584_v57  ;;  %1419 = vmatpush1.bf16.msra.mxu1 %v3589_v58 }
 0x25f   : > { %1379 = vmatprep.subr.bf16.mxu0 %v3592_v59  ;;  %1420 = vmatprep.subr.bf16.mxu1 %v3597_v46 }
 0x262   : > { %1380 = vmatpush1.bf16.msra.mxu0 %v3600_v47  ;;  %1421 = vmatpush1.bf16.msra.mxu1 %v3603_v43 }
 0x263   : > { %1381 = vmatprep.subr.bf16.mxu0 %v3608_v48  ;;  %1422 = vmatprep.subr.bf16.mxu1 %v3613_v60 }
 0x266   : > { %1382 = vmatpush1.bf16.msra.mxu0 %v3618_v61  ;;  %1423 = vmatpush1.bf16.msra.mxu1 %v3621_v62 }
 0x267   : > { %1383 = vmatprep.subr.bf16.mxu0 %v3626_v28  ;;  %1424 = vmatprep.subr.bf16.mxu1 %v3629_v29 }
 0x26a   : > { %1384 = vmatpush1.bf16.msra.mxu0 %v3634_v30  ;;  %1425 = vmatpush1.bf16.msra.mxu1 %v3637_v24 }
 0x26b   : > { %1385 = vmatprep.subr.bf16.mxu0 %v3642_v25  ;;  %1426 = vmatprep.subr.bf16.mxu1 %v3645_v26 }
 0x26e   : > { %1386 = vmatpush1.bf16.msra.mxu0 %v3650_v27  ;;  %1427 = vmatpush1.bf16.msra.mxu1 %v3653_v31 }
 0x26f   : > { %1484 = vmatprep.subr.bf16.mxu0 %v3530_v35  ;;  %1525 = vmatprep.subr.bf16.mxu1 %v3533_v36 }
 0x271   : > { %1404 = vmatmul.mubr.bf16.vlgmr.msra.gmra.mxu0 %v3039_v44  ;;  %1445 = vmatmul.mubr.bf16.vlgmr.msra.gmra.mxu1 %v3039_v44 }
 0x272   : > { %1485 = vmatpush1.bf16.msra.mxu0 %v3539_v37  ;;  %1526 = vmatpush1.bf16.msra.mxu1 %v3542_v38 }
 0x273   : > { %1486 = vmatprep.subr.bf16.mxu0 %v3546_v45  ;;  %1527 = vmatprep.subr.bf16.mxu1 %v3551_v49 }
 0x274   : > { %1516 = vmatprep.mubr.bf16.mxu0 %v3039_v44  ;;  %1557 = vmatprep.mubr.bf16.mxu1 %v3039_v44 }
 0x276   : > { %1487 = vmatpush1.bf16.msra.mxu0 %v3554_v50  ;;  %1528 = vmatpush1.bf16.msra.mxu1 %v3558_v51 }
 0x277   : > { %1488 = vmatprep.subr.bf16.mxu0 %v3562_v52  ;;  %1529 = vmatprep.subr.bf16.mxu1 %v3565_v32 }
 0x27a   : > { %1489 = vmatpush1.bf16.msra.mxu0 %v3568_v53  ;;  %1530 = vmatpush1.bf16.msra.mxu1 %v3571_v54 }
 0x27b   : > { %1490 = vmatprep.subr.bf16.mxu0 %v3576_v55  ;;  %1531 = vmatprep.subr.bf16.mxu1 %v3581_v56 }
 0x27e   : > { %1491 = vmatpush1.bf16.msra.mxu0 %v3584_v57  ;;  %1532 = vmatpush1.bf16.msra.mxu1 %v3589_v58 }
 0x27f   : > { %1492 = vmatprep.subr.bf16.mxu0 %v3592_v59  ;;  %1533 = vmatprep.subr.bf16.mxu1 %v3597_v46 }
 0x282   : > { %1493 = vmatpush1.bf16.msra.mxu0 %v3600_v47  ;;  %1534 = vmatpush1.bf16.msra.mxu1 %v3603_v43 }
 0x283   : > { %1494 = vmatprep.subr.bf16.mxu0 %v3608_v48  ;;  %1535 = vmatprep.subr.bf16.mxu1 %v3613_v60 }
 0x286   : > { %1495 = vmatpush1.bf16.msra.mxu0 %v3618_v61  ;;  %1536 = vmatpush1.bf16.msra.mxu1 %v3621_v62 }
 0x287   : > { %1496 = vmatprep.subr.bf16.mxu0 %v3626_v28  ;;  %1537 = vmatprep.subr.bf16.mxu1 %v3629_v29 }
 0x28a   : > { %1497 = vmatpush1.bf16.msra.mxu0 %v3634_v30  ;;  %1538 = vmatpush1.bf16.msra.mxu1 %v3637_v24 }
 0x28b   : > { %1498 = vmatprep.subr.bf16.mxu0 %v3642_v25  ;;  %1539 = vmatprep.subr.bf16.mxu1 %v3645_v26 }
 0x28e   : > { %1499 = vmatpush1.bf16.msra.mxu0 %v3650_v27  ;;  %1540 = vmatpush1.bf16.msra.mxu1 %v3653_v31 }
 0x28f   : > { %1598 = vmatprep.subr.bf16.mxu0 %v3530_v35  ;;  %1639 = vmatprep.subr.bf16.mxu1 %v3533_v36 }
 0x331   : > { %v1405_v20 = vpop.f32.mrf.mxu0  ;;  %v1446_v21 = vpop.f32.mrf.mxu1 }
 0x332   : > { %v1453_v23 = vadd.f32 %v1405_v20, %v1207_v63  ;;  %v1455_v4 = vadd.f32 %v1446_v21, %v1209_v11 }
 0x333   : > { %v1407_v16 = vpop.f32.mrf.mxu0  ;;  %v1448_v18 = vpop.f32.mrf.mxu1 }
 0x334   : > { %v1457_v19 = vmul.f32 0.5, %v1453_v23  ;;  %v1454_v12 = vadd.f32 %v1407_v16, %v1208_v22  ;;  %v1456_v8 = vadd.f32 %v1448_v18, %v1210_v17  ;;  %v1459_v5 = vmul.f32 0.5, %v1455_v4  ;;  %v1480_v23 = vld [vmem:[#allocation2 + $0x50] sm:$0xff]  ;;  %v1481_v18 = vld [vmem:[#allocation2 + $0x68] sm:$0xff] }
 0x335   : > { %v1409_v13 = vpop.f32.mrf.mxu0  ;;  %v1450_v14 = vpop.f32.mrf.mxu1 }
 0x336   : > { %2868 = vtanh.f32 %v1457_v19  ;;  %v1458_v15 = vmul.f32 0.5, %v1454_v12 }
 0x337   : > { %v1410_v9 = vpop.f32.mrf.mxu0  ;;  %v1451_v10 = vpop.f32.mrf.mxu1 }
 0x338   : > { %2870 = vtanh.f32 %v1458_v15 }
 0x339   : > { %2872 = vtanh.f32 %v1456_v8  ;;  %v1483_v8 = vld [vmem:[#allocation2 + $0x48] sm:$0xff] }
 0x33a   : > { %2874 = vtanh.f32 %v1459_v5 }
 0x343   : > { %v2869_v0 = vpop.eup %2868 }
 0x344   : > { %v1463_v1 = vmul.f32 0.5, %v2869_v0 }
 0x345   : > { %v2871_v2 = vpop.eup %2870 }
 0x346   : > { %v1466_v3 = vadd.f32 0.5, %v1463_v1  ;;  %v1464_v6 = vmul.f32 0.5, %v2871_v2  ;;  %v2873_v7 = vpop.eup %2872  ;;  %v1482_v1 = vld [vmem:[#allocation2 + $0x30] sm:$0xff] }
 0x347   : > { %v2875_v41 = vpop.eup %2874 }
 0x348   : > { %v1467_v33 = vadd.f32 0.5, %v1464_v6  ;;  %v1471_v39 = vmul.f32 %v2873_v7, %v1466_v3  ;;  %v1465_v42 = vmul.f32 0.5, %v2875_v41 }
 0x34a   : > { %v1470_v34 = vmul.f32 0.0, %v1467_v33  ;;  %v1468_v63 = vadd.f32 0.5, %v1465_v42 }
 0x34c   : > { %v3697_v40 = vadd.f32 %v1471_v39, %v1470_v34 }
 0x34e   : > { %2876 = vtanh.f32 %v3697_v40 }
 0x35b   : > { %v2877_v20 = vpop.eup %2876 }
 0x35c   : > { %v1474_v21 = vmul.f32 %v2877_v20, %v1468_v63 }
 0x35e   : > { %v1475_v22 = vpack.c.bf16 %v1474_v21, %v1474_v21 }
 0x360   : > { %1476 = vst [vmem:[#allocation3] sm:$0xf] %v1475_v22  ;;  %1517 = vmatmul.mubr.bf16.vlgmr.msra.gmra.mxu0 %v1475_v22  ;;  %1558 = vmatmul.mubr.bf16.vlgmr.msra.gmra.mxu1 %v1475_v22 }
 0x361   : > { %1599 = vmatpush1.bf16.msra.mxu0 %v3539_v37  ;;  %1640 = vmatpush1.bf16.msra.mxu1 %v3542_v38 }
 0x362   : > { %1600 = vmatprep.subr.bf16.mxu0 %v3546_v45  ;;  %1641 = vmatprep.subr.bf16.mxu1 %v3551_v49 }
 0x363   : > { %1630 = vmatprep.mubr.bf16.mxu0 %v3039_v44  ;;  %1671 = vmatprep.mubr.bf16.mxu1 %v3039_v44 }
 0x365   : > { %1601 = vmatpush1.bf16.msra.mxu0 %v3554_v50  ;;  %1642 = vmatpush1.bf16.msra.mxu1 %v3558_v51 }
 0x366   : > { %1602 = vmatprep.subr.bf16.mxu0 %v3562_v52  ;;  %1643 = vmatprep.subr.bf16.mxu1 %v3565_v32 }
 0x369   : > { %1603 = vmatpush1.bf16.msra.mxu0 %v3568_v53  ;;  %1644 = vmatpush1.bf16.msra.mxu1 %v3571_v54 }
 0x36a   : > { %1604 = vmatprep.subr.bf16.mxu0 %v3576_v55  ;;  %1645 = vmatprep.subr.bf16.mxu1 %v3581_v56 }
 0x36d   : > { %1605 = vmatpush1.bf16.msra.mxu0 %v3584_v57  ;;  %1646 = vmatpush1.bf16.msra.mxu1 %v3589_v58 }
 0x36e   : > { %1606 = vmatprep.subr.bf16.mxu0 %v3592_v59  ;;  %1647 = vmatprep.subr.bf16.mxu1 %v3597_v46 }
 0x371   : > { %1607 = vmatpush1.bf16.msra.mxu0 %v3600_v47  ;;  %1648 = vmatpush1.bf16.msra.mxu1 %v3603_v43 }
 0x372   : > { %1608 = vmatprep.subr.bf16.mxu0 %v3608_v48  ;;  %1649 = vmatprep.subr.bf16.mxu1 %v3613_v60 }
 0x375   : > { %1609 = vmatpush1.bf16.msra.mxu0 %v3618_v61  ;;  %1650 = vmatpush1.bf16.msra.mxu1 %v3621_v62 }
 0x376   : > { %1610 = vmatprep.subr.bf16.mxu0 %v3626_v28  ;;  %1651 = vmatprep.subr.bf16.mxu1 %v3629_v29 }
 0x379   : > { %1611 = vmatpush1.bf16.msra.mxu0 %v3634_v30  ;;  %1652 = vmatpush1.bf16.msra.mxu1 %v3637_v24 }
 0x37a   : > { %1612 = vmatprep.subr.bf16.mxu0 %v3642_v25  ;;  %1653 = vmatprep.subr.bf16.mxu1 %v3645_v26 }
 0x37d   : > { %1613 = vmatpush1.bf16.msra.mxu0 %v3650_v27  ;;  %1654 = vmatpush1.bf16.msra.mxu1 %v3653_v31 }
 0x37e   : > { %1712 = vmatprep.subr.bf16.mxu0 %v3530_v35  ;;  %1753 = vmatprep.subr.bf16.mxu1 %v3533_v36 }
 0x420   : > { %v1518_v16 = vpop.f32.mrf.mxu0  ;;  %v1559_v17 = vpop.f32.mrf.mxu1 }
 0x421   : > { %v1566_v19 = vadd.f32 %v1518_v16, %v1480_v23  ;;  %v1568_v2 = vadd.f32 %v1559_v17, %v1482_v1 }
 0x422   : > { %v1520_v12 = vpop.f32.mrf.mxu0  ;;  %v1561_v13 = vpop.f32.mrf.mxu1 }
 0x423   : > { %v1570_v14 = vmul.f32 0.5, %v1566_v19  ;;  %v1567_v15 = vadd.f32 %v1520_v12, %v1481_v18  ;;  %v1569_v0 = vadd.f32 %v1561_v13, %v1483_v8  ;;  %v1572_v3 = vmul.f32 0.5, %v1568_v2 }
 0x424   : > { %v1522_v9 = vpop.f32.mrf.mxu0  ;;  %v1563_v10 = vpop.f32.mrf.mxu1 }
 0x425   : > { %2878 = vtanh.f32 %v1570_v14  ;;  %v1571_v11 = vmul.f32 0.5, %v1567_v15  ;;  %v1595_v14 = vld [vmem:[#allocation2 + $0x88] sm:$0xff] }
 0x426   : > { %v1523_v4 = vpop.f32.mrf.mxu0  ;;  %v1564_v5 = vpop.f32.mrf.mxu1 }
 0x427   : > { %2880 = vtanh.f32 %v1571_v11  ;;  %v1597_v4 = vld [vmem:[#allocation2 + $0xb8] sm:$0xff] }
 0x428   : > { %2882 = vtanh.f32 %v1569_v0 }
 0x429   : > { %2884 = vtanh.f32 %v1572_v3 }
 0x432   : > { %v2879_v6 = vpop.eup %2878 }
 0x433   : > { %v1576_v7 = vmul.f32 0.5, %v2879_v6 }
 0x434   : > { %v2881_v33 = vpop.eup %2880 }
 0x435   : > { %v1579_v34 = vadd.f32 0.5, %v1576_v7  ;;  %v1577_v39 = vmul.f32 0.5, %v2881_v33  ;;  %v2883_v42 = vpop.eup %2882  ;;  %v1596_v7 = vld [vmem:[#allocation2 + $0xe8] sm:$0xff] }
 0x436   : > { %v2885_v22 = vpop.eup %2884 }
 0x437   : > { %v1580_v41 = vadd.f32 0.5, %v1577_v39  ;;  %v1584_v20 = vmul.f32 %v2883_v42, %v1579_v34  ;;  %v1578_v23 = vmul.f32 0.5, %v2885_v22 }
 0x439   : > { %v1583_v63 = vmul.f32 %v1580_v41, %v3697_v40  ;;  %v1581_v16 = vadd.f32 0.5, %v1578_v23  ;;  %v1594_v40 = vld [vmem:[#allocation2 + $0x80] sm:$0xff] }
 0x43b   : > { %v3735_v21 = vadd.f32 %v1584_v20, %v1583_v63 }
 0x43d   : > { %2886 = vtanh.f32 %v3735_v21 }
 0x44a   : > { %v2887_v17 = vpop.eup %2886 }
 0x44b   : > { %v1587_v18 = vmul.f32 %v2887_v17, %v1581_v16 }
 0x44d   : > { %v1588_v19 = vpack.c.bf16 %v1587_v18, %v1587_v18 }
 0x44f   : > { %1590 = vst [vmem:[#allocation3 + $0x4] sm:$0xf] %v1588_v19  ;;  %1631 = vmatmul.mubr.bf16.vlgmr.msra.gmra.mxu0 %v1588_v19  ;;  %1672 = vmatmul.mubr.bf16.vlgmr.msra.gmra.mxu1 %v1588_v19 }
 0x450   : > { %1713 = vmatpush1.bf16.msra.mxu0 %v3539_v37  ;;  %1754 = vmatpush1.bf16.msra.mxu1 %v3542_v38 }
 0x451   : > { %1714 = vmatprep.subr.bf16.mxu0 %v3546_v45  ;;  %1755 = vmatprep.subr.bf16.mxu1 %v3551_v49 }
 0x452   : > { %1744 = vmatprep.mubr.bf16.mxu0 %v3039_v44  ;;  %1785 = vmatprep.mubr.bf16.mxu1 %v3039_v44 }
 0x454   : > { %1715 = vmatpush1.bf16.msra.mxu0 %v3554_v50  ;;  %1756 = vmatpush1.bf16.msra.mxu1 %v3558_v51 }
 0x455   : > { %1716 = vmatprep.subr.bf16.mxu0 %v3562_v52  ;;  %1757 = vmatprep.subr.bf16.mxu1 %v3565_v32 }
 0x458   : > { %1717 = vmatpush1.bf16.msra.mxu0 %v3568_v53  ;;  %1758 = vmatpush1.bf16.msra.mxu1 %v3571_v54 }
 0x459   : > { %1718 = vmatprep.subr.bf16.mxu0 %v3576_v55  ;;  %1759 = vmatprep.subr.bf16.mxu1 %v3581_v56 }
 0x45c   : > { %1719 = vmatpush1.bf16.msra.mxu0 %v3584_v57  ;;  %1760 = vmatpush1.bf16.msra.mxu1 %v3589_v58 }
 0x45d   : > { %1720 = vmatprep.subr.bf16.mxu0 %v3592_v59  ;;  %1761 = vmatprep.subr.bf16.mxu1 %v3597_v46 }
 0x460   : > { %1721 = vmatpush1.bf16.msra.mxu0 %v3600_v47  ;;  %1762 = vmatpush1.bf16.msra.mxu1 %v3603_v43 }
 0x461   : > { %1722 = vmatprep.subr.bf16.mxu0 %v3608_v48  ;;  %1763 = vmatprep.subr.bf16.mxu1 %v3613_v60 }
 0x464   : > { %1723 = vmatpush1.bf16.msra.mxu0 %v3618_v61  ;;  %1764 = vmatpush1.bf16.msra.mxu1 %v3621_v62 }
 0x465   : > { %1724 = vmatprep.subr.bf16.mxu0 %v3626_v28  ;;  %1765 = vmatprep.subr.bf16.mxu1 %v3629_v29 }
 0x468   : > { %1725 = vmatpush1.bf16.msra.mxu0 %v3634_v30  ;;  %1766 = vmatpush1.bf16.msra.mxu1 %v3637_v24 }
 0x469   : > { %1726 = vmatprep.subr.bf16.mxu0 %v3642_v25  ;;  %1767 = vmatprep.subr.bf16.mxu1 %v3645_v26 }
 0x46c   : > { %1727 = vmatpush1.bf16.msra.mxu0 %v3650_v27  ;;  %1768 = vmatpush1.bf16.msra.mxu1 %v3653_v31 }
 0x46d   : > { %1826 = vmatprep.subr.bf16.mxu0 %v3530_v35  ;;  %1867 = vmatprep.subr.bf16.mxu1 %v3533_v36 }
 0x50f   : > { %v1632_v12 = vpop.f32.mrf.mxu0  ;;  %v1673_v13 = vpop.f32.mrf.mxu1 }
 0x510   : > { %v1680_v15 = vadd.f32 %v1632_v12, %v1594_v40  ;;  %v1682_v33 = vadd.f32 %v1673_v13, %v1596_v7 }
 0x511   : > { %v1634_v8 = vpop.f32.mrf.mxu0  ;;  %v1675_v9 = vpop.f32.mrf.mxu1 }
 0x512   : > { %v1684_v10 = vmul.f32 0.5, %v1680_v15  ;;  %v1681_v11 = vadd.f32 %v1634_v8, %v1595_v14  ;;  %v1683_v6 = vadd.f32 %v1675_v9, %v1597_v4  ;;  %v1686_v34 = vmul.f32 0.5, %v1682_v33 }
 0x513   : > { %v1636_v5 = vpop.f32.mrf.mxu0  ;;  %v1677_v0 = vpop.f32.mrf.mxu1 }
 0x514   : > { %2888 = vtanh.f32 %v1684_v10  ;;  %v1685_v1 = vmul.f32 0.5, %v1681_v11  ;;  %v1709_v10 = vld [vmem:[#allocation2 + $0xf0] sm:$0xff] }
 0x515   : > { %v1637_v2 = vpop.f32.mrf.mxu0  ;;  %v1678_v3 = vpop.f32.mrf.mxu1 }
 0x516   : > { %2890 = vtanh.f32 %v1685_v1  ;;  %v1711_v2 = vld [vmem:[#allocation2 + $0x78] sm:$0xff] }
 0x517   : > { %2892 = vtanh.f32 %v1683_v6 }
 0x518   : > { %2894 = vtanh.f32 %v1686_v34 }
 0x521   : > { %v2889_v39 = vpop.eup %2888 }
 0x522   : > { %v1690_v41 = vmul.f32 0.5, %v2889_v39 }
 0x523   : > { %v2891_v42 = vpop.eup %2890 }
 0x524   : > { %v1693_v63 = vadd.f32 0.5, %v1690_v41  ;;  %v1691_v20 = vmul.f32 0.5, %v2891_v42  ;;  %v2893_v23 = vpop.eup %2892  ;;  %v1710_v41 = vld [vmem:[#allocation2 + $0x8] sm:$0xff] }
 0x525   : > { %v2895_v19 = vpop.eup %2894 }
 0x526   : > { %v1694_v22 = vadd.f32 0.5, %v1691_v20  ;;  %v1698_v17 = vmul.f32 %v2893_v23, %v1693_v63  ;;  %v1692_v40 = vmul.f32 0.5, %v2895_v19 }
 0x528   : > { %v1697_v16 = vmul.f32 %v1694_v22, %v3735_v21  ;;  %v1695_v12 = vadd.f32 0.5, %v1692_v40  ;;  %v1708_v21 = vld [vmem:[#allocation2 + $0x60] sm:$0xff] }
 0x52a   : > { %v3773_v18 = vadd.f32 %v1698_v17, %v1697_v16 }
 0x52c   : > { %2896 = vtanh.f32 %v3773_v18 }
 0x539   : > { %v2897_v13 = vpop.eup %2896 }
 0x53a   : > { %v1701_v14 = vmul.f32 %v2897_v13, %v1695_v12 }
 0x53c   : > { %v1702_v15 = vpack.c.bf16 %v1701_v14, %v1701_v14 }
 0x53e   : > { %1704 = vst [vmem:[#allocation3 + $0x8] sm:$0xf] %v1702_v15  ;;  %1745 = vmatmul.mubr.bf16.vlgmr.msra.gmra.mxu0 %v1702_v15  ;;  %1786 = vmatmul.mubr.bf16.vlgmr.msra.gmra.mxu1 %v1702_v15 }
 0x53f   : > { %1827 = vmatpush1.bf16.msra.mxu0 %v3539_v37  ;;  %1868 = vmatpush1.bf16.msra.mxu1 %v3542_v38 }
 0x540   : > { %1828 = vmatprep.subr.bf16.mxu0 %v3546_v45  ;;  %1869 = vmatprep.subr.bf16.mxu1 %v3551_v49 }
 0x541   : > { %1858 = vmatprep.mubr.bf16.mxu0 %v3039_v44  ;;  %1899 = vmatprep.mubr.bf16.mxu1 %v3039_v44 }
 0x543   : > { %1829 = vmatpush1.bf16.msra.mxu0 %v3554_v50  ;;  %1870 = vmatpush1.bf16.msra.mxu1 %v3558_v51 }
 0x544   : > { %1830 = vmatprep.subr.bf16.mxu0 %v3562_v52  ;;  %1871 = vmatprep.subr.bf16.mxu1 %v3565_v32 }
 0x547   : > { %1831 = vmatpush1.bf16.msra.mxu0 %v3568_v53  ;;  %1872 = vmatpush1.bf16.msra.mxu1 %v3571_v54 }
 0x548   : > { %1832 = vmatprep.subr.bf16.mxu0 %v3576_v55  ;;  %1873 = vmatprep.subr.bf16.mxu1 %v3581_v56 }
 0x54b   : > { %1833 = vmatpush1.bf16.msra.mxu0 %v3584_v57  ;;  %1874 = vmatpush1.bf16.msra.mxu1 %v3589_v58 }
 0x54c   : > { %1834 = vmatprep.subr.bf16.mxu0 %v3592_v59  ;;  %1875 = vmatprep.subr.bf16.mxu1 %v3597_v46 }
 0x54f   : > { %1835 = vmatpush1.bf16.msra.mxu0 %v3600_v47  ;;  %1876 = vmatpush1.bf16.msra.mxu1 %v3603_v43 }
 0x550   : > { %1836 = vmatprep.subr.bf16.mxu0 %v3608_v48  ;;  %1877 = vmatprep.subr.bf16.mxu1 %v3613_v60 }
 0x553   : > { %1837 = vmatpush1.bf16.msra.mxu0 %v3618_v61  ;;  %1878 = vmatpush1.bf16.msra.mxu1 %v3621_v62 }
 0x554   : > { %1838 = vmatprep.subr.bf16.mxu0 %v3626_v28  ;;  %1879 = vmatprep.subr.bf16.mxu1 %v3629_v29 }
 0x557   : > { %1839 = vmatpush1.bf16.msra.mxu0 %v3634_v30  ;;  %1880 = vmatpush1.bf16.msra.mxu1 %v3637_v24 }
 0x558   : > { %1840 = vmatprep.subr.bf16.mxu0 %v3642_v25  ;;  %1881 = vmatprep.subr.bf16.mxu1 %v3645_v26 }
 0x55b   : > { %1841 = vmatpush1.bf16.msra.mxu0 %v3650_v27  ;;  %1882 = vmatpush1.bf16.msra.mxu1 %v3653_v31 }
 0x55c   : > { %1940 = vmatprep.subr.bf16.mxu0 %v3530_v35  ;;  %1981 = vmatprep.subr.bf16.mxu1 %v3533_v36 }
 0x5fe   : > { %v1746_v8 = vpop.f32.mrf.mxu0  ;;  %v1787_v9 = vpop.f32.mrf.mxu1 }
 0x5ff   : > { %v1794_v11 = vadd.f32 %v1746_v8, %v1708_v21  ;;  %v1796_v42 = vadd.f32 %v1787_v9, %v1710_v41 }
 0x600   : > { %v1748_v4 = vpop.f32.mrf.mxu0  ;;  %v1789_v5 = vpop.f32.mrf.mxu1 }
 0x601   : > { %v1798_v0 = vmul.f32 0.5, %v1794_v11  ;;  %v1795_v1 = vadd.f32 %v1748_v4, %v1709_v10  ;;  %v1797_v39 = vadd.f32 %v1789_v5, %v1711_v2  ;;  %v1800_v63 = vmul.f32 0.5, %v1796_v42 }
 0x602   : > { %v1750_v3 = vpop.f32.mrf.mxu0  ;;  %v1791_v6 = vpop.f32.mrf.mxu1 }
 0x603   : > { %2898 = vtanh.f32 %v1798_v0  ;;  %v1799_v7 = vmul.f32 0.5, %v1795_v1  ;;  %v1823_v0 = vld [vmem:[#allocation2 + $0x58] sm:$0xff] }
 0x604   : > { %v1751_v33 = vpop.f32.mrf.mxu0  ;;  %v1792_v34 = vpop.f32.mrf.mxu1 }
 0x605   : > { %2900 = vtanh.f32 %v1799_v7  ;;  %v1825_v33 = vld [vmem:[#allocation2 + $0xc8] sm:$0xff] }
 0x606   : > { %2902 = vtanh.f32 %v1797_v39 }
 0x607   : > { %2904 = vtanh.f32 %v1800_v63 }
 0x610   : > { %v2899_v20 = vpop.eup %2898 }
 0x611   : > { %v1804_v22 = vmul.f32 0.5, %v2899_v20  ;;  %v1824_v20 = vld [vmem:[#allocation2 + $0x40] sm:$0xff] }
 0x612   : > { %v2901_v23 = vpop.eup %2900 }
 0x613   : > { %v1807_v16 = vadd.f32 0.5, %v1804_v22  ;;  %v1805_v17 = vmul.f32 0.5, %v2901_v23  ;;  %v2903_v40 = vpop.eup %2902 }
 0x614   : > { %v2905_v15 = vpop.eup %2904 }
 0x615   : > { %v1808_v19 = vadd.f32 0.5, %v1805_v17  ;;  %v1812_v13 = vmul.f32 %v2903_v40, %v1807_v16  ;;  %v1806_v21 = vmul.f32 0.5, %v2905_v15 }
 0x617   : > { %v1811_v12 = vmul.f32 %v1808_v19, %v3773_v18  ;;  %v1809_v8 = vadd.f32 0.5, %v1806_v21  ;;  %v1822_v18 = vld [vmem:[#allocation2 + $0x38] sm:$0xff] }
 0x619   : > { %v3811_v14 = vadd.f32 %v1812_v13, %v1811_v12 }
 0x61b   : > { %2906 = vtanh.f32 %v3811_v14 }
 0x628   : > { %v2907_v9 = vpop.eup %2906 }
 0x629   : > { %v1815_v10 = vmul.f32 %v2907_v9, %v1809_v8 }
 0x62b   : > { %v1816_v11 = vpack.c.bf16 %v1815_v10, %v1815_v10 }
 0x62d   : > { %1818 = vst [vmem:[#allocation3 + $0xc] sm:$0xf] %v1816_v11  ;;  %1859 = vmatmul.mubr.bf16.vlgmr.msra.gmra.mxu0 %v1816_v11  ;;  %1900 = vmatmul.mubr.bf16.vlgmr.msra.gmra.mxu1 %v1816_v11 }
 0x62e   : > { %1941 = vmatpush1.bf16.msra.mxu0 %v3539_v37  ;;  %1982 = vmatpush1.bf16.msra.mxu1 %v3542_v38 }
 0x62f   : > { %1942 = vmatprep.subr.bf16.mxu0 %v3546_v45  ;;  %1983 = vmatprep.subr.bf16.mxu1 %v3551_v49 }
 0x630   : > { %1972 = vmatprep.mubr.bf16.mxu0 %v3039_v44  ;;  %2013 = vmatprep.mubr.bf16.mxu1 %v3039_v44 }
 0x632   : > { %1943 = vmatpush1.bf16.msra.mxu0 %v3554_v50  ;;  %1984 = vmatpush1.bf16.msra.mxu1 %v3558_v51 }
 0x633   : > { %1944 = vmatprep.subr.bf16.mxu0 %v3562_v52  ;;  %1985 = vmatprep.subr.bf16.mxu1 %v3565_v32 }
 0x636   : > { %1945 = vmatpush1.bf16.msra.mxu0 %v3568_v53  ;;  %1986 = vmatpush1.bf16.msra.mxu1 %v3571_v54 }
 0x637   : > { %1946 = vmatprep.subr.bf16.mxu0 %v3576_v55  ;;  %1987 = vmatprep.subr.bf16.mxu1 %v3581_v56 }
 0x63a   : > { %1947 = vmatpush1.bf16.msra.mxu0 %v3584_v57  ;;  %1988 = vmatpush1.bf16.msra.mxu1 %v3589_v58 }
 0x63b   : > { %1948 = vmatprep.subr.bf16.mxu0 %v3592_v59  ;;  %1989 = vmatprep.subr.bf16.mxu1 %v3597_v46 }
 0x63e   : > { %1949 = vmatpush1.bf16.msra.mxu0 %v3600_v47  ;;  %1990 = vmatpush1.bf16.msra.mxu1 %v3603_v43 }
 0x63f   : > { %1950 = vmatprep.subr.bf16.mxu0 %v3608_v48  ;;  %1991 = vmatprep.subr.bf16.mxu1 %v3613_v60 }
 0x642   : > { %1951 = vmatpush1.bf16.msra.mxu0 %v3618_v61  ;;  %1992 = vmatpush1.bf16.msra.mxu1 %v3621_v62 }
 0x643   : > { %1952 = vmatprep.subr.bf16.mxu0 %v3626_v28  ;;  %1993 = vmatprep.subr.bf16.mxu1 %v3629_v29 }
 0x646   : > { %1953 = vmatpush1.bf16.msra.mxu0 %v3634_v30  ;;  %1994 = vmatpush1.bf16.msra.mxu1 %v3637_v24 }
 0x647   : > { %1954 = vmatprep.subr.bf16.mxu0 %v3642_v25  ;;  %1995 = vmatprep.subr.bf16.mxu1 %v3645_v26 }
 0x64a   : > { %1955 = vmatpush1.bf16.msra.mxu0 %v3650_v27  ;;  %1996 = vmatpush1.bf16.msra.mxu1 %v3653_v31 }
 0x64b   : > { %2054 = vmatprep.subr.bf16.mxu0 %v3530_v35  ;;  %2095 = vmatprep.subr.bf16.mxu1 %v3533_v36 }
 0x6ed   : > { %v1860_v4 = vpop.f32.mrf.mxu0  ;;  %v1901_v5 = vpop.f32.mrf.mxu1 }
 0x6ee   : > { %v1908_v1 = vadd.f32 %v1860_v4, %v1822_v18  ;;  %v1910_v36 = vadd.f32 %v1901_v5, %v1824_v20 }
 0x6ef   : > { %v1862_v2 = vpop.f32.mrf.mxu0  ;;  %v1903_v3 = vpop.f32.mrf.mxu1 }
 0x6f0   : > { %v1912_v6 = vmul.f32 0.5, %v1908_v1  ;;  %v1909_v7 = vadd.f32 %v1862_v2, %v1823_v0  ;;  %v1911_v35 = vadd.f32 %v1903_v3, %v1825_v33  ;;  %v1914_v22 = vmul.f32 0.5, %v1910_v36 }
 0x6f1   : > { %v1864_v34 = vpop.f32.mrf.mxu0  ;;  %v1905_v39 = vpop.f32.mrf.mxu1 }
 0x6f2   : > { %2908 = vtanh.f32 %v1912_v6  ;;  %v1913_v41 = vmul.f32 0.5, %v1909_v7 }
 0x6f3   : > { %v1865_v42 = vpop.f32.mrf.mxu0  ;;  %v1906_v63 = vpop.f32.mrf.mxu1 }
 0x6f4   : > { %2910 = vtanh.f32 %v1913_v41 }
 0x6f5   : > { %2912 = vtanh.f32 %v1911_v35 }
 0x6f6   : > { %2914 = vtanh.f32 %v1914_v22 }
 0x6ff   : > { %v2909_v23 = vpop.eup %2908 }
 0x700   : > { %v1918_v16 = vmul.f32 0.5, %v2909_v23  ;;  %v2950_v23 = vld [vmem:[%s3168_s12 + $0xe0] ss:$16 sps:$4 sm:$0xff]  }
 0x701   : > { %v2911_v17 = vpop.eup %2910 }
 0x702   : > { %v1921_v19 = vadd.f32 0.5, %v1918_v16  ;;  %v1919_v40 = vmul.f32 0.5, %v2911_v17  ;;  %v2913_v13 = vpop.eup %2912  ;;  %v2951_v16 = vld [vmem:[%s3168_s12 + $0xe8] ss:$16 sps:$4 sm:$0xff]   ;;  %v2952_v17 = vld [vmem:[%s3168_s12 + $0xc4] ss:$16 sps:$4 sm:$0xff]  }
 0x703   : > { %v2915_v9 = vpop.eup %2914 }
 0x704   : > { %v1922_v12 = vadd.f32 0.5, %v1919_v40  ;;  %v1926_v21 = vmul.f32 %v2913_v13, %v1921_v19  ;;  %v1920_v10 = vmul.f32 0.5, %v2915_v9  ;;  %v2953_v19 = vld [vmem:[%s3168_s12 + $0xcc] ss:$16 sps:$4 sm:$0xff]   ;;  %v2954_v40 = vld [vmem:[%s3168_s12 + $0xc0] ss:$16 sps:$4 sm:$0xff]  }
 0x705   : > { %v2956_v13 = vld [vmem:[%s3168_s12 + $0xa4] ss:$16 sps:$4 sm:$0xff]  }
 0x706   : > { %v1925_v15 = vmul.f32 %v1922_v12, %v3811_v14  ;;  %v1923_v11 = vadd.f32 0.5, %v1920_v10  ;;  %v2955_v12 = vld [vmem:[%s3168_s12 + $0xc8] ss:$16 sps:$4 sm:$0xff]   ;;  %v2960_v9 = vld [vmem:[%s3168_s12 + $0x84] ss:$16 sps:$4 sm:$0xff]  }
 0x707   : > { %v2962_v10 = vld [vmem:[%s3168_s12 + $0x80] ss:$16 sps:$4 sm:$0xff]  }
 0x708   : > { %v3849_v8 = vadd.f32 %v1926_v21, %v1925_v15  ;;  %v2957_v15 = vld [vmem:[%s3168_s12 + $0xac] ss:$16 sps:$4 sm:$0xff]   ;;  %v2958_v21 = vld [vmem:[%s3168_s12 + $0xa0] ss:$16 sps:$4 sm:$0xff]  }
 0x70a   : > { %2916 = vtanh.f32 %v3849_v8 }
 0x717   : > { %v2917_v18 = vpop.eup %2916 }
 0x718   : > { %v1929_v4 = vmul.f32 %v2917_v18, %v1923_v11  ;;  %v2963_v11 = vld [vmem:[%s3168_s12 + $0x88] ss:$16 sps:$4 sm:$0xff]   ;;  %v2964_v18 = vld [vmem:[%s3168_s12 + $0x64] ss:$16 sps:$4 sm:$0xff]  }
 0x71a   : > { %v1930_v5 = vpack.c.bf16 %v1929_v4, %v1929_v4  ;;  %v2965_v4 = vld [vmem:[%s3168_s12 + $0x6c] ss:$16 sps:$4 sm:$0xff]  }
 0x71c   : > { %1932 = vst [vmem:[#allocation3 + $0x10] sm:$0xf] %v1930_v5  ;;  %1973 = vmatmul.mubr.bf16.vlgmr.msra.gmra.mxu0 %v1930_v5  ;;  %2014 = vmatmul.mubr.bf16.vlgmr.msra.gmra.mxu1 %v1930_v5  ;;  %v2966_v5 = vld [vmem:[%s3168_s12 + $0x60] ss:$16 sps:$4 sm:$0xff]  }
 0x71d   : > { %2055 = vmatpush1.bf16.msra.mxu0 %v3539_v37  ;;  %2096 = vmatpush1.bf16.msra.mxu1 %v3542_v38  ;;  %v2948_v37 = vld [vmem:[%s3168_s12 + $0xe4] ss:$16 sps:$4 sm:$0xff]   ;;  %v2949_v38 = vld [vmem:[%s3168_s12 + $0xec] ss:$16 sps:$4 sm:$0xff]  }
 0x71e   : > { %2056 = vmatprep.subr.bf16.mxu0 %v3546_v45  ;;  %2097 = vmatprep.subr.bf16.mxu1 %v3551_v49  ;;  %v1936_v45 = vld [vmem:[#allocation2 + $0xe0] sm:$0xff] }
 0x71f   : > { %2086 = vmatprep.mubr.bf16.mxu0 %v3039_v44  ;;  %2127 = vmatprep.mubr.bf16.mxu1 %v3039_v44 }
 0x721   : > { %2057 = vmatpush1.bf16.msra.mxu0 %v3554_v50  ;;  %2098 = vmatpush1.bf16.msra.mxu1 %v3558_v51  ;;  %v1937_v51 = vld [vmem:[#allocation2 + $0x90] sm:$0xff] }
 0x722   : > { %2058 = vmatprep.subr.bf16.mxu0 %v3562_v52  ;;  %2099 = vmatprep.subr.bf16.mxu1 %v3565_v32 }
 0x725   : > { %2059 = vmatpush1.bf16.msra.mxu0 %v3568_v53  ;;  %2100 = vmatpush1.bf16.msra.mxu1 %v3571_v54 }
 0x726   : > { %2060 = vmatprep.subr.bf16.mxu0 %v3576_v55  ;;  %2101 = vmatprep.subr.bf16.mxu1 %v3581_v56  ;;  %v1939_v56 = vld [vmem:[#allocation2 + $0xc0] sm:$0xff] }
 0x729   : > { %2061 = vmatpush1.bf16.msra.mxu0 %v3584_v57  ;;  %2102 = vmatpush1.bf16.msra.mxu1 %v3589_v58 }
 0x72a   : > { %2062 = vmatprep.subr.bf16.mxu0 %v3592_v59  ;;  %2103 = vmatprep.subr.bf16.mxu1 %v3597_v46 }
 0x72d   : > { %2063 = vmatpush1.bf16.msra.mxu0 %v3600_v47  ;;  %2104 = vmatpush1.bf16.msra.mxu1 %v3603_v43 }
 0x72e   : > { %2064 = vmatprep.subr.bf16.mxu0 %v3608_v48  ;;  %2105 = vmatprep.subr.bf16.mxu1 %v3613_v60  ;;  %v1938_v48 = vld [vmem:[#allocation2 + $0x70] sm:$0xff] }
 0x731   : > { %2065 = vmatpush1.bf16.msra.mxu0 %v3618_v61  ;;  %2106 = vmatpush1.bf16.msra.mxu1 %v3621_v62 }
 0x732   : > { %2066 = vmatprep.subr.bf16.mxu0 %v3626_v28  ;;  %2107 = vmatprep.subr.bf16.mxu1 %v3629_v29 }
 0x735   : > { %2067 = vmatpush1.bf16.msra.mxu0 %v3634_v30  ;;  %2108 = vmatpush1.bf16.msra.mxu1 %v3637_v24 }
 0x736   : > { %2068 = vmatprep.subr.bf16.mxu0 %v3642_v25  ;;  %2109 = vmatprep.subr.bf16.mxu1 %v3645_v26 }
 0x739   : > { %2069 = vmatpush1.bf16.msra.mxu0 %v3650_v27  ;;  %2110 = vmatpush1.bf16.msra.mxu1 %v3653_v31 }
 0x73a   : > { %2168 = vmatprep.subr.bf16.mxu0 %v2948_v37  ;;  %2209 = vmatprep.subr.bf16.mxu1 %v2949_v38  ;;  %v2967_v37 = vld [vmem:[%s3168_s12 + $0x68] ss:$16 sps:$4 sm:$0xff]   ;;  %v2968_v38 = vld [vmem:[%s3168_s12 + $0x44] ss:$16 sps:$4 sm:$0xff]  }
 0x7dc   : > { %v1974_v49 = vpop.f32.mrf.mxu0  ;;  %v2015_v50 = vpop.f32.mrf.mxu1 }
 0x7dd   : > { %v2022_v52 = vadd.f32 %v1974_v49, %v1936_v45  ;;  %v2024_v60 = vadd.f32 %v2015_v50, %v1938_v48  ;;  %v2969_v45 = vld [vmem:[%s3168_s12 + $0x4c] ss:$16 sps:$4 sm:$0xff]  }
 0x7de   : > { %v1976_v32 = vpop.f32.mrf.mxu0  ;;  %v2017_v53 = vpop.f32.mrf.mxu1  ;;  %v2050_v49 = vld [vmem:[#allocation2 + $0xa8] sm:$0xff] }
 0x7df   : > { %v2026_v54 = vmul.f32 0.5, %v2022_v52  ;;  %v2023_v55 = vadd.f32 %v1976_v32, %v1937_v51  ;;  %v2025_v43 = vadd.f32 %v2017_v53, %v1939_v56  ;;  %v2028_v14 = vmul.f32 0.5, %v2024_v60 }
 0x7e0   : > { %v1978_v57 = vpop.f32.mrf.mxu0  ;;  %v2019_v58 = vpop.f32.mrf.mxu1 }
 0x7e1   : > { %2918 = vtanh.f32 %v2026_v54  ;;  %v2027_v59 = vmul.f32 0.5, %v2023_v55  ;;  %v2052_v55 = vld [vmem:[#allocation2 + $0x10] sm:$0xff] }
 0x7e2   : > { %v1979_v46 = vpop.f32.mrf.mxu0  ;;  %v2020_v47 = vpop.f32.mrf.mxu1 }
 0x7e3   : > { %2920 = vtanh.f32 %v2027_v59 }
 0x7e4   : > { %2922 = vtanh.f32 %v2025_v43 }
 0x7e5   : > { %2924 = vtanh.f32 %v2028_v14 }
 0x7ee   : > { %v2919_v0 = vpop.eup %2918 }
 0x7ef   : > { %v2032_v1 = vmul.f32 0.5, %v2919_v0 }
 0x7f0   : > { %v2921_v2 = vpop.eup %2920 }
 0x7f1   : > { %v2035_v3 = vadd.f32 0.5, %v2032_v1  ;;  %v2033_v6 = vmul.f32 0.5, %v2921_v2  ;;  %v2923_v33 = vpop.eup %2922 }
 0x7f2   : > { %v2925_v42 = vpop.eup %2924 }
 0x7f3   : > { %v2036_v7 = vadd.f32 0.5, %v2033_v6  ;;  %v2040_v39 = vmul.f32 %v2923_v33, %v2035_v3  ;;  %v2034_v63 = vmul.f32 0.5, %v2925_v42 }
 0x7f5   : > { %v2039_v34 = vmul.f32 %v2036_v7, %v3849_v8  ;;  %v2037_v35 = vadd.f32 0.5, %v2034_v63  ;;  %v2959_v8 = vld [vmem:[%s3168_s12 + $0xa8] ss:$16 sps:$4 sm:$0xff]  }
 0x7f6   : > { %v2165_v63 = vld [vmem:[#allocation2 + $0xf8] sm:$0xff] }
 0x7f7   : > { %v3887_v41 = vadd.f32 %v2040_v39, %v2039_v34  ;;  %v2164_v34 = vld [vmem:[#allocation2 + $0xa0] sm:$0xff] }
 0x7f9   : > { %2926 = vtanh.f32 %v3887_v41 }
 0x806   : > { %v2927_v20 = vpop.eup %2926 }
 0x807   : > { %v2043_v36 = vmul.f32 %v2927_v20, %v2037_v35 }
 0x809   : > { %v2044_v22 = vpack.c.bf16 %v2043_v36, %v2043_v36 }
 0x80b   : > { %2046 = vst [vmem:[#allocation3 + $0x14] sm:$0xf] %v2044_v22  ;;  %2087 = vmatmul.mubr.bf16.vlgmr.msra.gmra.mxu0 %v2044_v22  ;;  %2128 = vmatmul.mubr.bf16.vlgmr.msra.gmra.mxu1 %v2044_v22 }
 0x80c   : > { %2169 = vmatpush1.bf16.msra.mxu0 %v2950_v23  ;;  %2210 = vmatpush1.bf16.msra.mxu1 %v2951_v16  ;;  %v2167_v23 = vld [vmem:[#allocation2 + $0x98] sm:$0xff] }
 0x80d   : > { %2170 = vmatprep.subr.bf16.mxu0 %v2952_v17  ;;  %2211 = vmatprep.subr.bf16.mxu1 %v2953_v19 }
 0x80e   : > { %2200 = vmatprep.mubr.bf16.mxu0 %v3039_v44  ;;  %2241 = vmatprep.mubr.bf16.mxu1 %v3039_v44  ;;  %v2961_v44 = vld [vmem:[%s3168_s12 + $0x8c] ss:$16 sps:$4 sm:$0xff]  }
 0x810   : > { %2171 = vmatpush1.bf16.msra.mxu0 %v2954_v40  ;;  %2212 = vmatpush1.bf16.msra.mxu1 %v2955_v12 }
 0x811   : > { %2172 = vmatprep.subr.bf16.mxu0 %v2956_v13  ;;  %2213 = vmatprep.subr.bf16.mxu1 %v2957_v15  ;;  %v2166_v15 = vld [vmem:[#allocation2 + $0x20] sm:$0xff] }
 0x814   : > { %2173 = vmatpush1.bf16.msra.mxu0 %v2958_v21  ;;  %2214 = vmatpush1.bf16.msra.mxu1 %v2959_v8 }
 0x815   : > { %2174 = vmatprep.subr.bf16.mxu0 %v2960_v9  ;;  %2215 = vmatprep.subr.bf16.mxu1 %v2961_v44 }
 0x818   : > { %2175 = vmatpush1.bf16.msra.mxu0 %v2962_v10  ;;  %2216 = vmatpush1.bf16.msra.mxu1 %v2963_v11 }
 0x819   : > { %2176 = vmatprep.subr.bf16.mxu0 %v2964_v18  ;;  %2217 = vmatprep.subr.bf16.mxu1 %v2965_v4 }
 0x81c   : > { %2177 = vmatpush1.bf16.msra.mxu0 %v2966_v5  ;;  %2218 = vmatpush1.bf16.msra.mxu1 %v2967_v37 }
 0x81d   : > { %2178 = vmatprep.subr.bf16.mxu0 %v2968_v38  ;;  %2219 = vmatprep.subr.bf16.mxu1 %v2969_v45 }
 0x820   : > { %2179 = vmatpush1.bf16.msra.mxu0 %v3618_v61  ;;  %2220 = vmatpush1.bf16.msra.mxu1 %v3621_v62  ;;  %v2051_v62 = vld [vmem:[#allocation2 + $0xd0] sm:$0xff] }
 0x821   : > { %2180 = vmatprep.subr.bf16.mxu0 %v3626_v28  ;;  %2221 = vmatprep.subr.bf16.mxu1 %v3629_v29 }
 0x824   : > { %2181 = vmatpush1.bf16.msra.mxu0 %v3634_v30  ;;  %2222 = vmatpush1.bf16.msra.mxu1 %v3637_v24  ;;  %v2053_v30 = vld [vmem:[#allocation2 + $0x28] sm:$0xff] }
 0x825   : > { %2182 = vmatprep.subr.bf16.mxu0 %v3642_v25  ;;  %2223 = vmatprep.subr.bf16.mxu1 %v3645_v26 }
 0x828   : > { %2183 = vmatpush1.bf16.msra.mxu0 %v3650_v27  ;;  %2224 = vmatpush1.bf16.msra.mxu1 %v3653_v31 }
 0x8cb   : > { %v2088_v61 = vpop.f32.mrf.mxu0  ;;  %v2129_v50 = vpop.f32.mrf.mxu1 }
 0x8cc   : > { %v2136_v51 = vadd.f32 %v2088_v61, %v2050_v49  ;;  %v2138_v31 = vadd.f32 %v2129_v50, %v2052_v55 }
 0x8cd   : > { %v2090_v28 = vpop.f32.mrf.mxu0  ;;  %v2131_v52 = vpop.f32.mrf.mxu1 }
 0x8ce   : > { %v2140_v29 = vmul.f32 0.5, %v2136_v51  ;;  %v2137_v32 = vadd.f32 %v2090_v28, %v2051_v62  ;;  %v2139_v27 = vadd.f32 %v2131_v52, %v2053_v30  ;;  %v2142_v56 = vmul.f32 0.5, %v2138_v31 }
 0x8cf   : > { %v2092_v53 = vpop.f32.mrf.mxu0  ;;  %v2133_v24 = vpop.f32.mrf.mxu1 }
 0x8d0   : > { %2928 = vtanh.f32 %v2140_v29  ;;  %v2141_v25 = vmul.f32 0.5, %v2137_v32 }
 0x8d1   : > { %v2093_v54 = vpop.f32.mrf.mxu0  ;;  %v2134_v26 = vpop.f32.mrf.mxu1 }
 0x8d2   : > { %2930 = vtanh.f32 %v2141_v25 }
 0x8d3   : > { %2932 = vtanh.f32 %v2139_v27 }
 0x8d4   : > { %2934 = vtanh.f32 %v2142_v56 }
 0x8dd   : > { %v2929_v57 = vpop.eup %2928 }
 0x8de   : > { %v2146_v58 = vmul.f32 0.5, %v2929_v57 }
 0x8df   : > { %v2931_v59 = vpop.eup %2930 }
 0x8e0   : > { %v2149_v46 = vadd.f32 0.5, %v2146_v58  ;;  %v2147_v47 = vmul.f32 0.5, %v2931_v59  ;;  %v2933_v48 = vpop.eup %2932 }
 0x8e1   : > { %v2935_v1 = vpop.eup %2934 }
 0x8e2   : > { %v2150_v43 = vadd.f32 0.5, %v2147_v47  ;;  %v2154_v14 = vmul.f32 %v2933_v48, %v2149_v46  ;;  %v2148_v2 = vmul.f32 0.5, %v2935_v1 }
 0x8e4   : > { %v2153_v60 = vmul.f32 %v2150_v43, %v3887_v41  ;;  %v2151_v3 = vadd.f32 0.5, %v2148_v2 }
 0x8e6   : > { %v2155_v0 = vadd.f32 %v2154_v14, %v2153_v60 }
 0x8e8   : > { %2936 = vtanh.f32 %v2155_v0 }
 0x8f5   : > { %v2937_v6 = vpop.eup %2936 }
 0x8f6   : > { %v2157_v7 = vmul.f32 %v2937_v6, %v2151_v3 }
 0x8f8   : > { %v2158_v33 = vpack.c.bf16 %v2157_v7, %v2157_v7 }
 0x8fa   : > { %2160 = vst [vmem:[#allocation3 + $0x18] sm:$0xf] %v2158_v33  ;;  %2201 = vmatmul.mubr.bf16.vlgmr.msra.gmra.mxu0 %v2158_v33  ;;  %2242 = vmatmul.mubr.bf16.vlgmr.msra.gmra.mxu1 %v2158_v33 }
 0x9ba   : > { %v2202_v39 = vpop.f32.mrf.mxu0  ;;  %v2243_v42 = vpop.f32.mrf.mxu1 }
 0x9bb   : > { %v2250_v35 = vadd.f32 %v2202_v39, %v2164_v34  ;;  %v2252_v21 = vadd.f32 %v2243_v42, %v2166_v15 }
 0x9bc   : > { %v2204_v20 = vpop.f32.mrf.mxu0  ;;  %v2245_v36 = vpop.f32.mrf.mxu1 }
 0x9bd   : > { %v2254_v41 = vmul.f32 0.5, %v2250_v35  ;;  %v2251_v22 = vadd.f32 %v2204_v20, %v2165_v63  ;;  %v2253_v13 = vadd.f32 %v2245_v36, %v2167_v23  ;;  %v2256_v8 = vmul.f32 0.5, %v2252_v21 }
 0x9be   : > { %v2206_v16 = vpop.f32.mrf.mxu0  ;;  %v2247_v17 = vpop.f32.mrf.mxu1 }
 0x9bf   : > { %2938 = vtanh.f32 %v2254_v41  ;;  %v2255_v19 = vmul.f32 0.5, %v2251_v22 }
 0x9c0   : > { %v2207_v40 = vpop.f32.mrf.mxu0  ;;  %v2248_v12 = vpop.f32.mrf.mxu1 }
 0x9c1   : > { %2940 = vtanh.f32 %v2255_v19 }
 0x9c2   : > { %2942 = vtanh.f32 %v2253_v13 }
 0x9c3   : > { %2944 = vtanh.f32 %v2256_v8 }
 0x9cc   : > { %v2939_v9 = vpop.eup %2938 }
 0x9cd   : > { %v2260_v44 = vmul.f32 0.5, %v2939_v9 }
 0x9ce   : > { %v2941_v10 = vpop.eup %2940 }
 0x9cf   : > { %v2263_v11 = vadd.f32 0.5, %v2260_v44  ;;  %v2261_v18 = vmul.f32 0.5, %v2941_v10  ;;  %v2943_v5 = vpop.eup %2942 }
 0x9d0   : > { %v2945_v49 = vpop.eup %2944 }
 0x9d1   : > { %v2264_v4 = vadd.f32 0.5, %v2261_v18  ;;  %v2268_v38 = vmul.f32 %v2943_v5, %v2263_v11  ;;  %v2262_v61 = vmul.f32 0.5, %v2945_v49 }
 0x9d3   : > { %v2267_v37 = vmul.f32 %v2264_v4, %v2155_v0  ;;  %v2265_v50 = vadd.f32 0.5, %v2262_v61 }
 0x9d5   : > { %v2269_v45 = vadd.f32 %v2268_v38, %v2267_v37 }
 0x9d7   : > { %2946 = vtanh.f32 %v2269_v45 }
 0x9e4   : > { %v2947_v62 = vpop.eup %2946 }
 0x9e5   : > { %v3923_v51 = vmul.f32 %v2947_v62, %v2265_v50  ;;  %2278 = sbr.rel (%p2655_p1) target bundleno = 2966 (0xb96), region = 68 }
 0x9e7   : > { %v2272_v28 = vpack.c.bf16 %v3923_v51, %v3923_v51 }
 0x9e9   : > { %2274 = vst [vmem:[#allocation3 + $0x1c] sm:$0xf] %v2272_v28 }
 0x9ea   : > { %v2294_v52 = vld [vmem:[%s4085_s4 + $0x78] sm:$0xff]  ;;  %v3040_v29 = vmov 0.0   ;;  %v2293_v32 = vld [vmem:[%s4085_s4 + $0x70] sm:$0xff]  ;;  %vm3041_vm0 = vmmov 0   ;;  %v2292_v30 = vld [vmem:[%s4085_s4 + $0x68] sm:$0xff] }
 0x9eb   : > { %2696 = vmatprep.subr.mxu0 %v3040_v29  ;;  %2728 = vmatprep.mubr.msk.f32.mxu0 %vm3041_vm0, %v3040_v29  ;;  %v2291_v53 = vld [vmem:[%s4085_s4 + $0x60] sm:$0xff]  ;;  %v2388_v24 = vld [vmem:[%s4087_s6 + $0x78] sm:$0xff]  ;;  %v2387_v25 = vld [vmem:[%s4087_s6 + $0x70] sm:$0xff] }
 0x9ec   : > { %2697 = vmatpush3.msra.mxu0 %v2294_v52  ;;  %2731 = vmatprep.subr.mxu1 %v3040_v29  ;;  %v2290_v54 = vld [vmem:[%s4085_s4 + $0x58] sm:$0xff]  ;;  %v2386_v26 = vld [vmem:[%s4087_s6 + $0x68] sm:$0xff]  ;;  %v2289_v27 = vld [vmem:[%s4085_s4 + $0x50] sm:$0xff] }
 0x9ed   : > { %2698 = vmatprep.subr.mxu0 %v3040_v29  ;;  %2763 = vmatprep.mubr.msk.f32.mxu1 %vm3041_vm0, %v3040_v29  ;;  %v2385_v55 = vld [vmem:[%s4087_s6 + $0x60] sm:$0xff]  ;;  %v2288_v31 = vld [vmem:[%s4085_s4 + $0x48] sm:$0xff]  ;;  %v2384_v56 = vld [vmem:[%s4087_s6 + $0x58] sm:$0xff] }
 0x9ee   : > { %2699 = vmatpush3.msra.mxu0 %v2293_v32  ;;  %2732 = vmatpush3.msra.mxu1 %v2388_v24  ;;  %v2287_v57 = vld [vmem:[%s4085_s4 + $0x40] sm:$0xff]  ;;  %v2383_v58 = vld [vmem:[%s4087_s6 + $0x50] sm:$0xff]  ;;  %v2286_v59 = vld [vmem:[%s4085_s4 + $0x38] sm:$0xff] }
 0x9ef   : > { %2700 = vmatprep.subr.mxu0 %v3040_v29  ;;  %2733 = vmatprep.subr.mxu1 %v3040_v29  ;;  %v2382_v46 = vld [vmem:[%s4087_s6 + $0x48] sm:$0xff]  ;;  %v2285_v47 = vld [vmem:[%s4085_s4 + $0x30] sm:$0xff]  ;;  %v2381_v43 = vld [vmem:[%s4087_s6 + $0x40] sm:$0xff] }
 0x9f0   : > { %2701 = vmatpush3.msra.mxu0 %v2292_v30  ;;  %2734 = vmatpush3.msra.mxu1 %v2387_v25  ;;  %v2284_v48 = vld [vmem:[%s4085_s4 + $0x28] sm:$0xff]  ;;  %v2380_v60 = vld [vmem:[%s4087_s6 + $0x38] sm:$0xff]  ;;  %v2283_v14 = vld [vmem:[%s4085_s4 + $0x20] sm:$0xff] }
 0x9f1   : > { %2702 = vmatprep.subr.mxu0 %v3040_v29  ;;  %2735 = vmatprep.subr.mxu1 %v3040_v29  ;;  %v2379_v0 = vld [vmem:[%s4087_s6 + $0x30] sm:$0xff]  ;;  %v2282_v1 = vld [vmem:[%s4085_s4 + $0x18] sm:$0xff]  ;;  %v2378_v2 = vld [vmem:[%s4087_s6 + $0x28] sm:$0xff] }
 0x9f2   : > { %2703 = vmatpush3.msra.mxu0 %v2291_v53  ;;  %2736 = vmatpush3.msra.mxu1 %v2386_v26  ;;  %v2281_v3 = vld [vmem:[%s4085_s4 + $0x10] sm:$0xff]  ;;  %v2377_v6 = vld [vmem:[%s4087_s6 + $0x20] sm:$0xff]  ;;  %v2280_v7 = vld [vmem:[%s4085_s4 + $0x8] sm:$0xff] }
 0x9f3   : > { %2704 = vmatprep.subr.mxu0 %v3040_v29  ;;  %2737 = vmatprep.subr.mxu1 %v3040_v29  ;;  %v2376_v33 = vld [vmem:[%s4087_s6 + $0x18] sm:$0xff]  ;;  %v2279_v34 = vld [vmem:[%s4085_s4] sm:$0xff]  ;;  %v2375_v39 = vld [vmem:[%s4087_s6 + $0x10] sm:$0xff] }
 0x9f4   : > { %2705 = vmatpush3.msra.mxu0 %v2290_v54  ;;  %2738 = vmatpush3.msra.mxu1 %v2385_v55  ;;  %v2374_v42 = vld [vmem:[%s4087_s6 + $0x8] sm:$0xff]  ;;  %v2373_v63 = vld [vmem:[%s4087_s6] sm:$0xff] }
 0x9f5   : > { %2706 = vmatprep.subr.mxu0 %v3040_v29  ;;  %2739 = vmatprep.subr.mxu1 %v3040_v29  ;;  %v2656_v35 = vld [vmem:[%s4086_s5] ss:$0 sm:$0xff] }
 0x9f6   : > { %2707 = vmatpush3.msra.mxu0 %v2289_v27  ;;  %2740 = vmatpush3.msra.mxu1 %v2384_v56  ;;  %v2657_v23 = vld [vmem:[%s4088_s7] ss:$0 sm:$0xff] }
 0x9f7   : > { %2708 = vmatprep.subr.mxu0 %v3040_v29  ;;  %2741 = vmatprep.subr.mxu1 %v3040_v29 }
 0x9f8   : > { %2709 = vmatpush3.msra.mxu0 %v2288_v31  ;;  %2742 = vmatpush3.msra.mxu1 %v2383_v58 }
 0x9f9   : > { %2710 = vmatprep.subr.mxu0 %v3040_v29  ;;  %2743 = vmatprep.subr.mxu1 %v3040_v29 }
 0x9fa   : > { %2711 = vmatpush3.msra.mxu0 %v2287_v57  ;;  %2744 = vmatpush3.msra.mxu1 %v2382_v46 }
 0x9fb   : > { %2712 = vmatprep.subr.mxu0 %v3040_v29  ;;  %2745 = vmatprep.subr.mxu1 %v3040_v29 }
 0x9fc   : > { %2713 = vmatpush3.msra.mxu0 %v2286_v59  ;;  %2746 = vmatpush3.msra.mxu1 %v2381_v43 }
 0x9fd   : > { %2714 = vmatprep.subr.mxu0 %v3040_v29  ;;  %2747 = vmatprep.subr.mxu1 %v3040_v29 }
 0x9fe   : > { %2715 = vmatpush3.msra.mxu0 %v2285_v47  ;;  %2748 = vmatpush3.msra.mxu1 %v2380_v60 }
 0x9ff   : > { %2716 = vmatprep.subr.mxu0 %v3040_v29  ;;  %2749 = vmatprep.subr.mxu1 %v3040_v29 }
 0xa00   : > { %2717 = vmatpush3.msra.mxu0 %v2284_v48  ;;  %2750 = vmatpush3.msra.mxu1 %v2379_v0 }
 0xa01   : > { %2718 = vmatprep.subr.mxu0 %v3040_v29  ;;  %2751 = vmatprep.subr.mxu1 %v3040_v29 }
 0xa02   : > { %2719 = vmatpush3.msra.mxu0 %v2283_v14  ;;  %2752 = vmatpush3.msra.mxu1 %v2378_v2 }
 0xa03   : > { %2720 = vmatprep.subr.mxu0 %v3040_v29  ;;  %2753 = vmatprep.subr.mxu1 %v3040_v29 }
 0xa04   : > { %2721 = vmatpush3.msra.mxu0 %v2282_v1  ;;  %2754 = vmatpush3.msra.mxu1 %v2377_v6 }
 0xa05   : > { %2722 = vmatprep.subr.mxu0 %v3040_v29  ;;  %2755 = vmatprep.subr.mxu1 %v3040_v29 }
 0xa06   : > { %2723 = vmatpush3.msra.mxu0 %v2281_v3  ;;  %2756 = vmatpush3.msra.mxu1 %v2376_v33 }
 0xa07   : > { %2724 = vmatprep.subr.mxu0 %v3040_v29  ;;  %2757 = vmatprep.subr.mxu1 %v3040_v29 }
 0xa08   : > { %2725 = vmatpush3.msra.mxu0 %v2280_v7  ;;  %2758 = vmatpush3.msra.mxu1 %v2375_v39 }
 0xa09   : > { %2726 = vmatprep.subr.mxu0 %v3040_v29  ;;  %2759 = vmatprep.subr.mxu1 %v3040_v29 }
 0xa0a   : > { %2727 = vmatpush3.msra.mxu0 %v2279_v34  ;;  %2760 = vmatpush3.msra.mxu1 %v2374_v42 }
 0xa0b   : > { %2729 = vmatmul.mubr.f32.vlgmr.msra.gmra.mxu0 %v3923_v51  ;;  %2761 = vmatprep.subr.mxu1 %v3040_v29 }
 0xa0c   : > { %2762 = vmatpush3.msra.mxu1 %v2373_v63 }
 0xacb   : > { %v2368_v20 = vpop.f32.mrf.mxu0 }
 0xacc   : > { %v2369_v36 = vadd.f32 %v2656_v35, %v2368_v20 }
 0xacd   : > { %v2730_v41 = vpop.f32.mrf.mxu0 }
 0xace   : > { %v2372_v22 = vmax.f32 %v2369_v36, 0.0 }
 0xad0   : > { %2764 = vmatmul.mubr.f32.vlgmr.msra.gmra.mxu1 %v2372_v22 }
 0xb90   : > { %v2462_v16 = vpop.f32.mrf.mxu1 }
 0xb91   : > { %v2463_v17 = vadd.f32 %v2657_v23, %v2462_v16 }
 0xb92   : > { %v2765_v19 = vpop.f32.mrf.mxu1 }
 0xb93   : > { %v2466_v40 = vmax.f32 %v2463_v17, 0.0 }
 0xb95   : > { %2467 = vst [vmem:[%s4089_s8] sm:$0xff] %v2466_v40 }
 0xb96 PF: > { %p18_p2 = scmp.ge.s32.totalorder %s3109_s10, 5   ;;  %s4097_s27 = smov %s3024_s28 }
 0xb97   : > { %s4098_s28 = smov %s3028_s29  ;;  %s4099_s29 = smov %s3119_s13 }
 0xb98   : > { %s4100_s30 = smov %s3109_s10  ;;  %20 = sbr.rel (!%p18_p2) target bundleno = 3 (0x3), region = 121 }
 0xb9d   :  { %2479 = vsyncpa [#allocation5], 1 }
 0xb9e   :  { %2481 = vsyncpa [#allocation5 + $0x1], 1 }

</bundles_post_ra>
